<compile_context>
chip_gen: v6e
topology: v6e:2x2x1
jax: 0.10.0
libtpu: 0.0.40
codegen_flags: <defaults>
</compile_context>

<pallas_src>
import functools

import jax
import jax.numpy as jnp
from jax.experimental import pallas as pl
from jax.experimental.pallas import tpu as pltpu

LANE = 128


def _round_up(v, m):
    return (v + m - 1) // m * m


# ----------------------------- Pallas kernel ------------------------------- #

def _graphsaint_fused_kernel(a_hbm_ref, x_hbm_ref, wrel_ref, wroot_ref,
                             shift_ref, o_ref, a_vmem, act_ref, dma_sem, *,
                             num_layers, tile_m, out_channels):
    """One grid step = one (layer, destination-row-tile) pair.

    a_hbm_ref : [Np, Np] bf16  adjacency, left in HBM (pl.ANY)
    x_hbm_ref : [Np, Cp] bf16  padded input features, left in HBM (pl.ANY)
    wrel_ref  : [Cp, Cp] bf16  layer's lin_rel weight * BN scale (zero padded)
    wroot_ref : [Cp, Cp] bf16  layer's lin_root weight * BN scale (zero padded)
    shift_ref : [1, Cp]  f32   folded BN shift + scale*b_rel (b_rel for last)
    o_ref     : [TM, Cp] f32   output row tile (written only at the last layer)
    a_vmem    : [Np, Np] bf16  single-buffered resident copy of A
    act_ref   : [2, Np, Cp] bf16  ping-pong activation scratch
    dma_sem   : DMA semaphores for the two one-time residency copies
    """
    l = pl.program_id(0)
    r = pl.program_id(1)
    row0 = pl.multiple_of(r * tile_m, tile_m)

    # One-time residency DMAs: A -> VMEM scratch (single buffered), and the
    # padded input features directly into activation slot 1 (read by layer 0).
    @pl.when((l == 0) & (r == 0))
    def _():
        cp_a = pltpu.make_async_copy(a_hbm_ref, a_vmem, dma_sem.at[0])
        cp_x = pltpu.make_async_copy(x_hbm_ref, act_ref.at[1], dma_sem.at[1])
        cp_a.start()
        cp_x.start()
        cp_a.wait()
        cp_x.wait()

    # Layer l reads act[(l+1) % 2] and writes act[l % 2]; layer 0 reads slot 1
    # which holds x.  Dynamic index is on the untiled leading axis (cheap).
    read_slot = (l + 1) % 2
    prev_full = act_ref[read_slot, :, :]                    # [Np, Cp] bf16
    prev_tile = act_ref[read_slot, pl.ds(row0, tile_m), :]  # [TM, Cp] bf16
    a_tile = a_vmem[pl.ds(row0, tile_m), :]                 # [TM, Np] bf16

    # Neighbor aggregation + the two GraphConv projections on the MXU
    # (bf16 operands, f32 accumulation).  BN scale is pre-folded into the
    # weight columns, so only the shift remains in the epilogue.
    agg = jnp.dot(a_tile, prev_full, preferred_element_type=jnp.float32)
    h = (jnp.dot(agg.astype(jnp.bfloat16), wrel_ref[...],
                 preferred_element_type=jnp.float32)
         + jnp.dot(prev_tile, wroot_ref[...],
                   preferred_element_type=jnp.float32))
    h = h + shift_ref[...]

    @pl.when(l < num_layers - 1)
    def _():
        act_bf16 = jnp.maximum(h, 0.0).astype(jnp.bfloat16)  # ReLU; dropout=id

        @pl.when(l % 2 == 0)
        def _():
            act_ref[0, pl.ds(row0, tile_m), :] = act_bf16

        @pl.when(l % 2 == 1)
        def _():
            act_ref[1, pl.ds(row0, tile_m), :] = act_bf16
        # NOTE: no o_ref write here -> no dead VMEM stores / HBM writebacks.

    @pl.when(l == num_layers - 1)
    def _():
        # Masked log_softmax over the valid (unpadded) class columns.
        lane = jax.lax.broadcasted_iota(jnp.int32, h.shape, 1)
        valid = lane < out_channels
        hm = jnp.where(valid, h, jnp.float32(-1e30))
        m = jnp.max(hm, axis=-1, keepdims=True)
        s = hm - m
        e = jnp.where(valid, jnp.exp(s), 0.0)
        lse = jnp.log(jnp.sum(e, axis=-1, keepdims=True))
        o_ref[...] = s - lse


# ------------------------------ Pallas wrapper ------------------------------ #

def _graphsaint_pallas(A, x, w_rel, w_root, shift, *, num_layers,
                       out_channels, tile_m):
    n_pad = A.shape[0]
    c_pad = w_rel.shape[-1]
    row_tiles = n_pad // tile_m
    last = num_layers - 1

    kernel = functools.partial(_graphsaint_fused_kernel,
                               num_layers=num_layers, tile_m=tile_m,
                               out_channels=out_channels)

    flops = int(num_layers * (2 * n_pad * n_pad * c_pad
                              + 4 * n_pad * c_pad * c_pad))
    bytes_accessed = int(A.size * A.dtype.itemsize
                         + x.size * x.dtype.itemsize
                         + w_rel.size * w_rel.dtype.itemsize
                         + w_root.size * w_root.dtype.itemsize
                         + shift.size * 4
                         + n_pad * c_pad * 4)
    cost = pl.CostEstimate(flops=flops, transcendentals=int(n_pad * c_pad),
                           bytes_accessed=bytes_accessed)

    # Explicit VMEM budget: resident A (single copy) + ping-pong activations +
    # double-buffered per-layer weights/shift + double-buffered out tiles.
    vmem_bytes = (n_pad * n_pad * 2
                  + 2 * n_pad * c_pad * 2
                  + 2 * 2 * c_pad * c_pad * 2
                  + 2 * c_pad * 4
                  + 2 * tile_m * c_pad * 4)
    vmem_limit = int(min(100 * 1024 * 1024, 2 * vmem_bytes + (16 << 20)))

    # Hidden layers never write the output: park their (unwritten) block on
    # index (0, 0) so no dead HBM writeback DMA is issued; the last layer
    # sweeps the real row tiles.  No output block is ever revisited.
    def out_index(l, r):
        return (jnp.where(l == last, r, 0), 0)

    return pl.pallas_call(
        kernel,
        out_shape=jax.ShapeDtypeStruct((n_pad, c_pad), jnp.float32),
        grid=(num_layers, row_tiles),
        in_specs=[
            pl.BlockSpec(memory_space=pl.ANY),   # A: stays in HBM, copied once
            pl.BlockSpec(memory_space=pl.ANY),   # x: stays in HBM, copied once
            pl.BlockSpec((None, c_pad, c_pad), lambda l, r: (l, 0, 0)),  # W_rel[l]
            pl.BlockSpec((None, c_pad, c_pad), lambda l, r: (l, 0, 0)),  # W_root[l]
            pl.BlockSpec((None, 1, c_pad), lambda l, r: (l, 0, 0)),      # shift[l]
        ],
        out_specs=pl.BlockSpec((tile_m, c_pad), out_index),
        scratch_shapes=[
            pltpu.VMEM((n_pad, n_pad), jnp.bfloat16),      # resident A copy
            pltpu.VMEM((2, n_pad, c_pad), jnp.bfloat16),   # ping-pong acts
            pltpu.SemaphoreType.DMA((2,)),
        ],
        # Both axes are "arbitrary": layer l+1 reads ALL row tiles of layer l
        # through private VMEM scratch, so neither axis may go megacore-parallel.
        compiler_params=pltpu.CompilerParams(
            dimension_semantics=("arbitrary", "arbitrary"),
            vmem_limit_bytes=vmem_limit),
        cost_estimate=cost,
    )(A, x, w_rel, w_root, shift)


@functools.partial(jax.jit,
                   static_argnames=("num_layers", "out_channels", "tile_m"))
def graphsaint_forward(A, x, w_rel, w_root, shift, *, num_layers,
                       out_channels, tile_m):
    return _graphsaint_pallas(A, x, w_rel, w_root, shift,
                              num_layers=num_layers,
                              out_channels=out_channels, tile_m=tile_m)


# ------------------------------ Model params -------------------------------- #

def init_graphsaint_params(key, in_channels, hidden_channels, out_channels,
                           num_layers):
    """Deterministic parameter init mirroring the PyTorch module's shapes."""
    params = []
    eps = 1e-5
    c_in = in_channels
    for i in range(num_layers):
        c_out = out_channels if i == num_layers - 1 else hidden_channels
        key, k1, k2, k3, k4, k5 = jax.random.split(key, 6)
        bound = 1.0 / jnp.sqrt(float(c_in))
        # GraphConv: lin_rel (with bias), lin_root (no bias); stored as
        # [C_in, C_out] so the kernel computes x @ W.
        w_rel = jax.random.uniform(k1, (c_in, c_out), jnp.float32, -bound, bound)
        b_rel = jax.random.uniform(k2, (1, c_out), jnp.float32, -bound, bound)
        w_root = jax.random.uniform(k3, (c_in, c_out), jnp.float32, -bound, bound)
        # BatchNorm (eval-mode) params (the last layer's BN exists in the
        # PyTorch module but is unused in forward()).
        gamma = 1.0 + 0.1 * jax.random.normal(k4, (1, c_out), jnp.float32)
        beta = 0.1 * jax.random.normal(k5, (1, c_out), jnp.float32)
        running_mean = jnp.zeros((1, c_out), jnp.float32)
        running_var = jnp.ones((1, c_out), jnp.float32)
        bn_scale = gamma / jnp.sqrt(running_var + eps)
        bn_shift = beta - running_mean * bn_scale
        params.append(dict(w_rel=w_rel, b_rel=b_rel, w_root=w_root,
                           bn_scale=bn_scale, bn_shift=bn_shift))
        c_in = c_out
    return params


def pack_params(params, c_pad):
    """Pad per-layer params to [L, c_pad, c_pad], fold the BN scale into the
    weight columns, fold b_rel into the shift, cast matmul operands to bf16."""
    # TODO(synk): optionally pad the contraction (K) dim only to the bf16
    #             sublane granule (16) with non-square weights to avoid wasted
    #             MXU work for small early-layer channel counts.
    L = len(params)
    w_rel = jnp.zeros((L, c_pad, c_pad), jnp.float32)
    w_root = jnp.zeros((L, c_pad, c_pad), jnp.float32)
    shift = jnp.zeros((L, 1, c_pad), jnp.float32)
    for l, p in enumerate(params):
        ci, co = p["w_rel"].shape
        if l < L - 1:
            sc = p["bn_scale"]                                # [1, co]
            sh = p["bn_shift"] + sc * p["b_rel"]              # fold b_rel
        else:
            sc = jnp.ones((1, co), jnp.float32)               # no BN on last
            sh = p["b_rel"]
        w_rel = w_rel.at[l, :ci, :co].set(p["w_rel"] * sc)    # fold BN scale
        w_root = w_root.at[l, :ci, :co].set(p["w_root"] * sc)
        shift = shift.at[l, :, :co].set(sh)
    return (w_rel.astype(jnp.bfloat16), w_root.astype(jnp.bfloat16), shift)


def dense_adjacency(edge_index, edge_weight, num_nodes):
    """A[dst, src] = edge_weight  (source_to_target message passing)."""
    src, dst = edge_index[0], edge_index[1]
    A = jnp.zeros((num_nodes, num_nodes), jnp.float32)
    return A.at[dst, src].add(edge_weight)


def pad2d(x, rows, cols):
    return jnp.zeros((rows, cols), x.dtype).at[:x.shape[0], :x.shape[1]].set(x)


def reference_forward(A_p, x_p, w_rel, w_root, shift, *, num_layers, N,
                      out_channels):
    """Pure-JAX reference using exactly the packed (folded, bf16) parameters
    and the same bf16-operand / f32-accumulate math as the kernel."""
    h = x_p
    for l in range(num_layers):
        agg = jnp.dot(A_p, h, preferred_element_type=jnp.float32)
        z = (jnp.dot(agg.astype(jnp.bfloat16), w_rel[l],
                     preferred_element_type=jnp.float32)
             + jnp.dot(h, w_root[l], preferred_element_type=jnp.float32)
             + shift[l])
        if l < num_layers - 1:
            h = jnp.maximum(z, 0.0).astype(jnp.bfloat16)   # ReLU; dropout = id
        else:
            logits = z[:N, :out_channels]
            return jax.nn.log_softmax(logits, axis=-1)


# ---------------------------------- Main ------------------------------------ #

if __name__ == "__main__":
    key = jax.random.PRNGKey(0)

    N = 500            # nodes in the sampled subgraph (pads to 512)
    E = 4000           # edges
    in_channels = 32
    hidden_channels = 64
    out_channels = 16
    num_layers = 3
    dropout = 0.5      # identity at inference
    tile_m = 256       # 256-wide MXU tiles (v6e/v7x); exercises 2 row tiles

    key, kx, ke, kw, kp = jax.random.split(key, 5)
    x = jax.random.normal(kx, (N, in_channels), jnp.float32)
    edge_index = jax.random.randint(ke, (2, E), 0, N, jnp.int32)
    edge_weight = jax.random.uniform(kw, (E,), jnp.float32, 0.1, 1.0)

    params = init_graphsaint_params(kp, in_channels, hidden_channels,
                                    out_channels, num_layers)

    # ---- glue: dense adjacency, lane-dense padding, bf16 matmul operands ----
    c_pad = _round_up(max(in_channels, hidden_channels, out_channels), LANE)
    n_pad = _round_up(N, tile_m)

    A = dense_adjacency(edge_index, edge_weight, N)
    A_p = pad2d(A, n_pad, n_pad).astype(jnp.bfloat16)   # zero padding (required)
    x_p = pad2d(x, n_pad, c_pad).astype(jnp.bfloat16)
    w_rel_s, w_root_s, shift_s = pack_params(params, c_pad)

    out_p = graphsaint_forward(A_p, x_p, w_rel_s, w_root_s, shift_s,
                               num_layers=num_layers,
                               out_channels=out_channels, tile_m=tile_m)
    out_p = jax.block_until_ready(out_p)
    out = out_p[:N, :out_channels]

    assert out.shape == (N, out_channels)
    # log_softmax rows must exp-sum to ~1
    row_sums = jnp.sum(jnp.exp(out), axis=-1)
    assert bool(jnp.all(jnp.abs(row_sums - 1.0) < 1e-4))
    # Compare against a pure-JAX reference using the same bf16/f32 math.
    ref = reference_forward(A_p, x_p, w_rel_s, w_root_s, shift_s,
                            num_layers=num_layers, N=N,
                            out_channels=out_channels)
    assert bool(jnp.max(jnp.abs(out - ref)) < 2e-2)
    print("KERNEL_OK")
</pallas_src>

<mosaic_0001>
module attributes {stable_mosaic.version = 11 : i64} {
  func.func @_graphsaint_fused_kernel(%arg0: i32, %arg1: i32, %arg2: memref<512x512xbf16, #tpu.memory_space<any>>, %arg3: memref<512x128xbf16, #tpu.memory_space<any>>, %arg4: memref<1x128x128xbf16, #tpu.memory_space<vmem>>, %arg5: memref<1x128x128xbf16, #tpu.memory_space<vmem>>, %arg6: memref<1x1x128xf32, #tpu.memory_space<vmem>>, %arg7: memref<256x128xf32, #tpu.memory_space<vmem>>, %arg8: memref<512x512xbf16, #tpu.memory_space<vmem>>, %arg9: memref<2x512x128xbf16, #tpu.memory_space<vmem>>, %arg10: memref<2x!tpu.dma_semaphore, #tpu.memory_space<semaphore_mem>>) attributes {dimension_semantics = [#tpu.dimension_semantics<arbitrary>, #tpu.dimension_semantics<arbitrary>], iteration_bounds = array<i64: 3, 2>, scalar_prefetch = 0 : i64, scratch_operands = 3 : i64, tpu.core_type = #tpu.core_type<tc>, window_params = [{}, {}, {transform_indices = @transform_2, window_bounds = array<i64: 1, 128, 128>}, {transform_indices = @transform_3, window_bounds = array<i64: 1, 128, 128>}, {transform_indices = @transform_4, window_bounds = array<i64: 1, 1, 128>}, {transform_indices = @transform_5, window_bounds = array<i64: 256, 128>}]} {
    %c256_i32 = arith.constant 256 : i32
    %0 = arith.muli %arg1, %c256_i32 : i32
    %1 = tpu.assume_multiple %0, 256 : i32
    %c0_i32 = arith.constant 0 : i32
    %2 = arith.cmpi eq, %arg0, %c0_i32 : i32
    %c0_i32_0 = arith.constant 0 : i32
    %3 = arith.cmpi eq, %arg1, %c0_i32_0 : i32
    %4 = arith.andi %2, %3 : i1
    %5 = arith.extui %4 : i1 to i32
    %c0_i32_1 = arith.constant 0 : i32
    %6 = arith.cmpi ne, %5, %c0_i32_1 : i32
    scf.if %6 {
      %c0_i32_25 = arith.constant 0 : i32
      %46 = tpu.memref_slice %arg10[%c0_i32_25] : memref<2x!tpu.dma_semaphore, #tpu.memory_space<semaphore_mem>> -> memref<1x!tpu.dma_semaphore, #tpu.memory_space<semaphore_mem>>
      %47 = tpu.memref_squeeze %46 : memref<1x!tpu.dma_semaphore, #tpu.memory_space<semaphore_mem>> -> memref<!tpu.dma_semaphore, #tpu.memory_space<semaphore_mem>>
      tpu.enqueue_dma source(%arg2 : memref<512x512xbf16, #tpu.memory_space<any>>) target(%arg8 : memref<512x512xbf16, #tpu.memory_space<vmem>>) target_semaphore(%47 : memref<!tpu.dma_semaphore, #tpu.memory_space<semaphore_mem>>)
      %c1_i32_26 = arith.constant 1 : i32
      %c1_i32_27 = arith.constant 1 : i32
      %c0_i32_28 = arith.constant 0 : i32
      %c0_i32_29 = arith.constant 0 : i32
      %48 = tpu.memref_slice %arg9[%c1_i32_26, %c0_i32_28, %c0_i32_29] : memref<2x512x128xbf16, #tpu.memory_space<vmem>> -> memref<1x512x128xbf16, #tpu.memory_space<vmem>>
      %49 = tpu.memref_squeeze %48 : memref<1x512x128xbf16, #tpu.memory_space<vmem>> -> memref<512x128xbf16, #tpu.memory_space<vmem>>
      %50 = tpu.memref_slice %arg10[%c1_i32_27] : memref<2x!tpu.dma_semaphore, #tpu.memory_space<semaphore_mem>> -> memref<1x!tpu.dma_semaphore, #tpu.memory_space<semaphore_mem>>
      %51 = tpu.memref_squeeze %50 : memref<1x!tpu.dma_semaphore, #tpu.memory_space<semaphore_mem>> -> memref<!tpu.dma_semaphore, #tpu.memory_space<semaphore_mem>>
      tpu.enqueue_dma source(%arg3 : memref<512x128xbf16, #tpu.memory_space<any>>) target(%49 : memref<512x128xbf16, #tpu.memory_space<vmem>>) target_semaphore(%51 : memref<!tpu.dma_semaphore, #tpu.memory_space<semaphore_mem>>)
      %c0_i32_30 = arith.constant 0 : i32
      %52 = tpu.memref_slice %arg10[%c0_i32_30] : memref<2x!tpu.dma_semaphore, #tpu.memory_space<semaphore_mem>> -> memref<1x!tpu.dma_semaphore, #tpu.memory_space<semaphore_mem>>
      %53 = tpu.memref_squeeze %52 : memref<1x!tpu.dma_semaphore, #tpu.memory_space<semaphore_mem>> -> memref<!tpu.dma_semaphore, #tpu.memory_space<semaphore_mem>>
      tpu.wait_dma2 semaphore(%53 : memref<!tpu.dma_semaphore, #tpu.memory_space<semaphore_mem>>) src(%arg2 : memref<512x512xbf16, #tpu.memory_space<any>>) dst(%arg8 : memref<512x512xbf16, #tpu.memory_space<vmem>>)
      %c1_i32_31 = arith.constant 1 : i32
      %c1_i32_32 = arith.constant 1 : i32
      %c0_i32_33 = arith.constant 0 : i32
      %c0_i32_34 = arith.constant 0 : i32
      %54 = tpu.memref_slice %arg9[%c1_i32_31, %c0_i32_33, %c0_i32_34] : memref<2x512x128xbf16, #tpu.memory_space<vmem>> -> memref<1x512x128xbf16, #tpu.memory_space<vmem>>
      %55 = tpu.memref_squeeze %54 : memref<1x512x128xbf16, #tpu.memory_space<vmem>> -> memref<512x128xbf16, #tpu.memory_space<vmem>>
      %56 = tpu.memref_slice %arg10[%c1_i32_32] : memref<2x!tpu.dma_semaphore, #tpu.memory_space<semaphore_mem>> -> memref<1x!tpu.dma_semaphore, #tpu.memory_space<semaphore_mem>>
      %57 = tpu.memref_squeeze %56 : memref<1x!tpu.dma_semaphore, #tpu.memory_space<semaphore_mem>> -> memref<!tpu.dma_semaphore, #tpu.memory_space<semaphore_mem>>
      tpu.wait_dma2 semaphore(%57 : memref<!tpu.dma_semaphore, #tpu.memory_space<semaphore_mem>>) src(%arg3 : memref<512x128xbf16, #tpu.memory_space<any>>) dst(%55 : memref<512x128xbf16, #tpu.memory_space<vmem>>)
    } else {
    }
    %c1_i32 = arith.constant 1 : i32
    %7 = arith.addi %arg0, %c1_i32 : i32
    %c2_i32 = arith.constant 2 : i32
    %c0_i32_2 = arith.constant 0 : i32
    %8 = arith.cmpi eq, %c2_i32, %c0_i32_2 : i32
    %c1_i32_3 = arith.constant 1 : i32
    %9 = arith.select %8, %c1_i32_3, %c2_i32 : i32
    %10 = arith.remsi %7, %9 : i32
    %c0_i32_4 = arith.constant 0 : i32
    %11 = arith.cmpi ne, %10, %c0_i32_4 : i32
    %c0_i32_5 = arith.constant 0 : i32
    %12 = arith.cmpi slt, %10, %c0_i32_5 : i32
    %c0_i32_6 = arith.constant 0 : i32
    %13 = arith.cmpi slt, %9, %c0_i32_6 : i32
    %14 = arith.xori %12, %13 : i1
    %15 = arith.andi %14, %11 : i1
    %16 = arith.addi %10, %9 : i32
    %17 = arith.select %15, %16, %10 : i32
    %18 = arith.index_cast %17 : i32 to index
    %c0 = arith.constant 0 : index
    %c0_7 = arith.constant 0 : index
    %19 = vector.load %arg9[%18, %c0, %c0_7] : memref<2x512x128xbf16, #tpu.memory_space<vmem>>, vector<1x512x128xbf16>
    %20 = vector.shape_cast %19 : vector<1x512x128xbf16> to vector<512x128xbf16>
    %21 = arith.index_cast %17 : i32 to index
    %22 = arith.index_cast %1 : i32 to index
    %c0_8 = arith.constant 0 : index
    %23 = vector.load %arg9[%21, %22, %c0_8] : memref<2x512x128xbf16, #tpu.memory_space<vmem>>, vector<1x256x128xbf16>
    %24 = vector.shape_cast %23 : vector<1x256x128xbf16> to vector<256x128xbf16>
    %25 = arith.index_cast %1 : i32 to index
    %c0_9 = arith.constant 0 : index
    %26 = vector.load %arg8[%25, %c0_9] : memref<512x512xbf16, #tpu.memory_space<vmem>>, vector<256x512xbf16>
    %cst = arith.constant dense<0.000000e+00> : vector<256x128xf32>
    %27 = tpu.matmul %26, %20, %cst {dimension_numbers = #tpu.dot_dimension_numbers<[1], [0], [0], [1], [0, 0, 1, 1], [], []>} : vector<256x512xbf16>, vector<512x128xbf16>, vector<256x128xf32> -> vector<256x128xf32>
    %28 = arith.truncf %27 : vector<256x128xf32> to vector<256x128xbf16>
    %c0_10 = arith.constant 0 : index
    %c0_11 = arith.constant 0 : index
    %c0_12 = arith.constant 0 : index
    %29 = vector.load %arg4[%c0_10, %c0_11, %c0_12] : memref<1x128x128xbf16, #tpu.memory_space<vmem>>, vector<1x128x128xbf16>
    %30 = vector.shape_cast %29 : vector<1x128x128xbf16> to vector<128x128xbf16>
    %cst_13 = arith.constant dense<0.000000e+00> : vector<256x128xf32>
    %31 = tpu.matmul %28, %30, %cst_13 {dimension_numbers = #tpu.dot_dimension_numbers<[1], [0], [0], [1], [0, 0, 1, 1], [], []>} : vector<256x128xbf16>, vector<128x128xbf16>, vector<256x128xf32> -> vector<256x128xf32>
    %c0_14 = arith.constant 0 : index
    %c0_15 = arith.constant 0 : index
    %c0_16 = arith.constant 0 : index
    %32 = vector.load %arg5[%c0_14, %c0_15, %c0_16] : memref<1x128x128xbf16, #tpu.memory_space<vmem>>, vector<1x128x128xbf16>
    %33 = vector.shape_cast %32 : vector<1x128x128xbf16> to vector<128x128xbf16>
    %cst_17 = arith.constant dense<0.000000e+00> : vector<256x128xf32>
    %34 = tpu.matmul %24, %33, %cst_17 {dimension_numbers = #tpu.dot_dimension_numbers<[1], [0], [0], [1], [0, 0, 1, 1], [], []>} : vector<256x128xbf16>, vector<128x128xbf16>, vector<256x128xf32> -> vector<256x128xf32>
    %35 = arith.addf %31, %34 : vector<256x128xf32>
    %c0_18 = arith.constant 0 : index
    %c0_19 = arith.constant 0 : index
    %c0_20 = arith.constant 0 : index
    %36 = vector.load %arg6[%c0_18, %c0_19, %c0_20] : memref<1x1x128xf32, #tpu.memory_space<vmem>>, vector<1x1x128xf32>
    %37 = vector.shape_cast %36 : vector<1x1x128xf32> to vector<1x128xf32>
    %38 = vector.broadcast %37 : vector<1x128xf32> to vector<256x128xf32>
    %39 = arith.addf %35, %38 : vector<256x128xf32>
    %c2_i32_21 = arith.constant 2 : i32
    %40 = arith.cmpi slt, %arg0, %c2_i32_21 : i32
    %41 = arith.extui %40 : i1 to i32
    %c0_i32_22 = arith.constant 0 : i32
    %42 = arith.cmpi ne, %41, %c0_i32_22 : i32
    scf.if %42 {
      %cst_25 = arith.constant 0.000000e+00 : f32
      %46 = vector.broadcast %cst_25 : f32 to vector<256x128xf32>
      %47 = arith.maximumf %39, %46 : vector<256x128xf32>
      %48 = arith.truncf %47 : vector<256x128xf32> to vector<256x128xbf16>
      %c2_i32_26 = arith.constant 2 : i32
      %c0_i32_27 = arith.constant 0 : i32
      %49 = arith.cmpi eq, %c2_i32_26, %c0_i32_27 : i32
      %c1_i32_28 = arith.constant 1 : i32
      %50 = arith.select %49, %c1_i32_28, %c2_i32_26 : i32
      %51 = arith.remsi %arg0, %50 : i32
      %c0_i32_29 = arith.constant 0 : i32
      %52 = arith.cmpi ne, %51, %c0_i32_29 : i32
      %c0_i32_30 = arith.constant 0 : i32
      %53 = arith.cmpi slt, %51, %c0_i32_30 : i32
      %c0_i32_31 = arith.constant 0 : i32
      %54 = arith.cmpi slt, %50, %c0_i32_31 : i32
      %55 = arith.xori %53, %54 : i1
      %56 = arith.andi %55, %52 : i1
      %57 = arith.addi %51, %50 : i32
      %58 = arith.select %56, %57, %51 : i32
      %c0_i32_32 = arith.constant 0 : i32
      %59 = arith.cmpi eq, %58, %c0_i32_32 : i32
      %60 = arith.extui %59 : i1 to i32
      %c0_i32_33 = arith.constant 0 : i32
      %61 = arith.cmpi ne, %60, %c0_i32_33 : i32
      scf.if %61 {
        %c0_42 = arith.constant 0 : index
        %75 = arith.index_cast %1 : i32 to index
        %c0_43 = arith.constant 0 : index
        %76 = vector.load %arg9[%c0_42, %75, %c0_43] : memref<2x512x128xbf16, #tpu.memory_space<vmem>>, vector<1x256x128xbf16>
        %77 = vector.shape_cast %76 : vector<1x256x128xbf16> to vector<256x128xbf16>
        %78 = vector.shape_cast %48 : vector<256x128xbf16> to vector<1x256x128xbf16>
        tpu.vector_store %arg9[%c0_42, %75, %c0_43], %78 {strides = array<i32>} : memref<2x512x128xbf16, #tpu.memory_space<vmem>>, vector<1x256x128xbf16>,
      } else {
      }
      %c2_i32_34 = arith.constant 2 : i32
      %c0_i32_35 = arith.constant 0 : i32
      %62 = arith.cmpi eq, %c2_i32_34, %c0_i32_35 : i32
      %c1_i32_36 = arith.constant 1 : i32
      %63 = arith.select %62, %c1_i32_36, %c2_i32_34 : i32
      %64 = arith.remsi %arg0, %63 : i32
      %c0_i32_37 = arith.constant 0 : i32
      %65 = arith.cmpi ne, %64, %c0_i32_37 : i32
      %c0_i32_38 = arith.constant 0 : i32
      %66 = arith.cmpi slt, %64, %c0_i32_38 : i32
      %c0_i32_39 = arith.constant 0 : i32
      %67 = arith.cmpi slt, %63, %c0_i32_39 : i32
      %68 = arith.xori %66, %67 : i1
      %69 = arith.andi %68, %65 : i1
      %70 = arith.addi %64, %63 : i32
      %71 = arith.select %69, %70, %64 : i32
      %c1_i32_40 = arith.constant 1 : i32
      %72 = arith.cmpi eq, %71, %c1_i32_40 : i32
      %73 = arith.extui %72 : i1 to i32
      %c0_i32_41 = arith.constant 0 : i32
      %74 = arith.cmpi ne, %73, %c0_i32_41 : i32
      scf.if %74 {
        %c1 = arith.constant 1 : index
        %75 = arith.index_cast %1 : i32 to index
        %c0_42 = arith.constant 0 : index
        %76 = vector.load %arg9[%c1, %75, %c0_42] : memref<2x512x128xbf16, #tpu.memory_space<vmem>>, vector<1x256x128xbf16>
        %77 = vector.shape_cast %76 : vector<1x256x128xbf16> to vector<256x128xbf16>
        %78 = vector.shape_cast %48 : vector<256x128xbf16> to vector<1x256x128xbf16>
        tpu.vector_store %arg9[%c1, %75, %c0_42], %78 {strides = array<i32>} : memref<2x512x128xbf16, #tpu.memory_space<vmem>>, vector<1x256x128xbf16>,
      } else {
      }
    } else {
    }
    %c2_i32_23 = arith.constant 2 : i32
    %43 = arith.cmpi eq, %arg0, %c2_i32_23 : i32
    %44 = arith.extui %43 : i1 to i32
    %c0_i32_24 = arith.constant 0 : i32
    %45 = arith.cmpi ne, %44, %c0_i32_24 : i32
    scf.if %45 {
      %46 = tpu.iota {dimensions = array<i32: 1>} : vector<256x128xi32>
      %c16_i32 = arith.constant 16 : i32
      %47 = vector.broadcast %c16_i32 : i32 to vector<256x128xi32>
      %48 = arith.cmpi slt, %46, %47 : vector<256x128xi32>
      %cst_25 = arith.constant -1.000000e+30 : f32
      %49 = vector.broadcast %cst_25 : f32 to vector<256x128xf32>
      %50 = arith.select %48, %39, %49 : vector<256x128xi1>, vector<256x128xf32>
      %cst_26 = arith.constant dense<0xFF800000> : vector<256xf32>
      %51 = vector.multi_reduction <maximumf>, %50, %cst_26 [1] : vector<256x128xf32> to vector<256xf32>
      %52 = vector.shape_cast %51 : vector<256xf32> to vector<256x1xf32>
      %53 = vector.broadcast %52 : vector<256x1xf32> to vector<256x128xf32>
      %54 = arith.subf %50, %53 : vector<256x128xf32>
      %55 = math.exp %54 : vector<256x128xf32>
      %cst_27 = arith.constant 0.000000e+00 : f32
      %56 = vector.broadcast %cst_27 : f32 to vector<256x128xf32>
      %57 = arith.select %48, %55, %56 : vector<256x128xi1>, vector<256x128xf32>
      %cst_28 = arith.constant dense<0.000000e+00> : vector<256xf32>
      %58 = vector.multi_reduction <add>, %57, %cst_28 [1] : vector<256x128xf32> to vector<256xf32>
      %59 = vector.shape_cast %58 : vector<256xf32> to vector<256x1xf32>
      %60 = math.log %59 : vector<256x1xf32>
      %61 = vector.broadcast %60 : vector<256x1xf32> to vector<256x128xf32>
      %62 = arith.subf %54, %61 : vector<256x128xf32>
      %c0_29 = arith.constant 0 : index
      %c0_30 = arith.constant 0 : index
      %63 = vector.load %arg7[%c0_29, %c0_30] : memref<256x128xf32, #tpu.memory_space<vmem>>, vector<256x128xf32>
      tpu.vector_store %arg7[%c0_29, %c0_30], %62 {strides = array<i32>} : memref<256x128xf32, #tpu.memory_space<vmem>>, vector<256x128xf32>,
    } else {
    }
    return
  }
  func.func @transform_2(%arg0: i32, %arg1: i32) -> (i32, i32, i32) {
    %c0_i32 = arith.constant 0 : i32
    %c0_i32_0 = arith.constant 0 : i32
    %c0_i32_1 = arith.constant 0 : i32
    return %arg0, %c0_i32, %c0_i32_0 : i32, i32, i32
  }
  func.func @transform_3(%arg0: i32, %arg1: i32) -> (i32, i32, i32) {
    %c0_i32 = arith.constant 0 : i32
    %c0_i32_0 = arith.constant 0 : i32
    %c0_i32_1 = arith.constant 0 : i32
    return %arg0, %c0_i32, %c0_i32_0 : i32, i32, i32
  }
  func.func @transform_4(%arg0: i32, %arg1: i32) -> (i32, i32, i32) {
    %c0_i32 = arith.constant 0 : i32
    %c0_i32_0 = arith.constant 0 : i32
    %c0_i32_1 = arith.constant 0 : i32
    return %arg0, %c0_i32, %c0_i32_0 : i32, i32, i32
  }
  func.func @transform_5(%arg0: i32, %arg1: i32) -> (i32, i32) {
    %c2_i32 = arith.constant 2 : i32
    %0 = arith.cmpi eq, %arg0, %c2_i32 : i32
    %c0_i32 = arith.constant 0 : i32
    %1 = arith.select %0, %arg1, %c0_i32 : i32
    %c0_i32_0 = arith.constant 0 : i32
    %c0_i32_1 = arith.constant 0 : i32
    return %1, %c0_i32_0 : i32, i32
  }
}

</mosaic_0001>

<bundles_post_ra>
// kernel: graphsaint_forward.1
= control target key start
LH: loop header
LB: loop body
LE: loop exit
PB: predicated region body
PF: predicated region fallthrough
CT: control target
= control target key end

     0   :  { %s5600_s0 = inlined_call_operand.hbm [shape: bf16[512,512], index: 0, kind: input, shape index: {}]   ;;  %s5601_s1 = inlined_call_operand.hbm [shape: bf16[512,128], index: 1, kind: input, shape index: {}]   ;;  %s5602_s2 = inlined_call_operand.hbm [shape: bf16[3,128,128], index: 2, kind: input, shape index: {}]   ;;  %s5603_s3 = inlined_call_operand.hbm [shape: bf16[3,128,128], index: 3, kind: input, shape index: {}]   ;;  %s5604_s4 = inlined_call_operand.vmem [shape: f32[3,1,128], index: 4, kind: input, shape index: {}]   ;;  %s5605_s5 = inlined_call_operand.hbm [shape: f32[512,128], index: 5, kind: output, shape index: {}]  }
   0x1   :  { %5622 = sst [smem:[#allocation30_spill]] %s5602_s2 }
   0x2   :  { %10 = vsyncpa [#allocation6], 0 }
   0x3   :  { %12 = vsyncpa [#allocation6 + $0x1], 0 }
   0x4   :  { %13 = vsyncpa [#allocation9], 0 }
   0x5   :  { %15 = vsyncpa [#allocation9 + $0x1], 0 }
   0x6   :  { %16 = vsyncpa [#allocation7], 0 }
   0x7   :  { %18 = vsyncpa [#allocation7 + $0x1], 0  ;;  %s4448_s18 = smov 0   ;;  %s4450_s19 = smov 0  }
   0x8   :  { %s4452_s20 = smov 0   ;;  %s4454_s21 = smov 0  }
   0x9   :  { %s4456_s22 = smov 0   ;;  %s4458_s23 = smov 0  }
   0xa   :  { %s4460_s24 = smov 0   ;;  %s4462_s25 = smov 0  }
   0xb   :  { %s4464_s26 = smov 0   ;;  %s4466_s27 = smov 0  }
   0xc   :  { %s4468_s28 = smov 0  }
   0xd LB: > { %5623 = sst [smem:[#allocation22_spill]] %s4374_s20  ;;  %s2868_s29 = sadd.s32 4294967295, %s4406_s28   ;;  %s4406_s28 = sphi %s4468_s28, %s24_s28   ;;  %s4402_s27 = sphi %s4466_s27, %s5671_s27   ;;  %s4398_s26 = sphi %s4464_s26, %s5664_s26   ;;  %s4394_s25 = sphi %s4462_s25, %s5670_s25   ;;  %s4390_s24 = sphi %s4460_s24, %s5663_s24   ;;  %s4386_s23 = sphi %s4458_s23, %s5662_s23   ;;  %s4382_s22 = sphi %s4456_s22, %s5669_s22   ;;  %s4378_s21 = sphi %s4454_s21, %s5668_s21   ;;  %s4374_s20 = sphi %s4452_s20, %s5660_s20   ;;  %s4370_s19 = sphi %s4450_s19, %s5667_s19   ;;  %s4366_s18 = sphi %s4448_s18, %s5666_s18  }
   0xe   : > { %5624 = sst [smem:[#allocation23_spill]] %s4386_s23  ;;  %s2869_s30 = sadd.s32 4294967294, %s4406_s28  }
   0xf   : > { %5625 = sst [smem:[#allocation24_spill]] %s4398_s26  ;;  %s33_s6 = sadd.s32 1, %s4398_s26 }
  0x10   : > { %s36_s7 = sadd.s32 1, %s4402_s27  ;;  %p34_p0 = scmp.ge.s32.totalorder %s33_s6, 2 }
  0x11   : > { %s43_s8 = sadd.s32 1, %s4386_s23  ;;  %p50_p1 = scmp.ne.s32.totalorder %s4386_s23, %s4382_s22 }
  0x12   : > { %p51_p2 = scmp.eq.s32.totalorder %s4406_s28, 0  ;;  %s5673_s6 = smov (%p34_p0, %s33_s6), 0 }
  0x13   : > { %5626 = sst [smem:[#allocation25_spill]] %s5673_s6  ;;  %s5675_s7 = smov (!%p34_p0, %s36_s7), %s4402_s27 }
  0x14   : > { %p4512_p3 = por %p51_p2, %p50_p1  ;;  %p56_p4 = scmp.ne.s32.totalorder %s4382_s22, %s4378_s21 }
  0x15   : > { %p38_p5 = scmp.ge.s32.totalorder %s5675_s7, 3  ;;  %p57_p6 = scmp.eq.s32.totalorder %s2868_s29, 0 }
  0x16   : > { %p118_p7 = scmp.eq.s32.totalorder %s4402_s27, 2  ;;  %s125_s10 = sadd.s32 1, %s4374_s20 }
  0x17   : > { %s5677_s7 = smov (%p38_p5, %s5675_s7), 0  ;;  %p4521_p8 = por %p57_p6, %p56_p4 }
  0x18   : > { %5628 = sst [smem:[#allocation26_spill]] %s5677_s7  ;;  %p135_p9 = scmp.ne.s32.totalorder %s4374_s20, %s4370_s19 }
  0x19   : > { %s40_s12 = ssub.s32 %s4402_s27, %s5677_s7  ;;  %p120_p10 = scmp.eq.s32.totalorder %s5677_s7, 2 }
  0x1a   : > { %p41_p11 = scmp.eq.s32.totalorder %s40_s12, 0  ;;  %p136_p12 = scmp.eq.s32.totalorder %s2868_s29, 5 }
  0x1b   : > { %s119_s13 = scalar_select %p118_p7, %s4398_s26, 0 }
  0x1c   : > { %s4532_s14 = scalar_select %p41_p11, %s4386_s23, %s43_s8  }
  0x1d   : > { %s121_s15 = scalar_select %p120_p10, %s5673_s6, 0 }
  0x1e   : > { %5630 = sst [smem:[#allocation27_spill]] %s4532_s14  ;;  %p4535_p13 = por %p136_p12, %p135_p9 }
  0x1f   : > { %p141_p0 = scmp.ne.s32.totalorder %s4370_s19, %s4366_s18  ;;  %s122_s17 = ssub.s32 %s119_s13, %s121_s15 }
  0x20   : > { %p142_p1 = scmp.eq.s32.totalorder %s2869_s30, 5  ;;  %p123_p2 = scmp.eq.s32.totalorder %s122_s17, 0 }
  0x21   : > { %p3782_p5 = scmp.lt.s32.totalorder %s4406_s28, 6  ;;  %s4550_s29 = sand.u32 1, %s4386_s23  }
  0x22   : > { %p4541_p4 = por %p142_p1, %p141_p0  ;;  %s5609_s8 = sshll.u32 %s4402_s27, 10 }
  0x23   : > { %s4547_s12 = scalar_select %p123_p2, %s4374_s20, %s125_s10  }
  0x24   : > { %s5632_s21 = scalar_select %p4541_p4, 1, 0 }
  0x25   : > { %5634 = sst [smem:[#allocation29_spill]] %s4547_s12  ;;  %s2872_s7 = sshll.u32 %s4550_s29, 6 }
  0x26   : > { %5633 = sst [smem:[#allocation28_spill]] %s5632_s21  ;;  %s166_s30 = scalar_lea.vmem [#allocation5], %s2872_s7 }
  0x27   : > { %s5635_s2 = sld [smem:[#allocation30_spill]]  ;;  %s173_s15 = sshll.u32 %s166_s30, 4  ;;  %s174_s15 = int_to_ptr.vmem [resolvable:$true] %s173_s15 }
  0x28   : > { %p4561_p6 = pnand %p3782_p5, %p4512_p3  ;;  %s163_s10 = scalar_lea.sflag [#allocation6], %s4550_s29 }
  0x29   : > { %s4179_s14 = scalar_lea.vmem %s174_s15, 1024  ;;  %s4408_s26 = smov [#allocation5]  }
  0x2a   : > { %p4168_p7 = pneg %p4561_p6  ;;  %p4180_p9 = scmp.ne.s32.totalorder %s174_s15, %s4179_s14 }
  0x2b   : > { %s4184_s6 = sshll.u32 %s4408_s26, 4  ;;  %s4185_s6 = int_to_ptr.vmem [resolvable:$false] %s4184_s6 }
  0x2c   : > { %p4182_p10 = pnand %p4180_p9, %p4168_p7  ;;  %s4186_s9 = scalar_lea.vmem %s4185_s6, 2048 }
  0x2d   : > { %s172_s13 = scalar_lea.hbm %s5635_s2, %s5609_s8  ;;  %p4187_p3 = scmp.lt.s32.totalorder %s174_s15, %s4185_s6 }
  0x2e   : > { %p4183_p11 = pneg %p4182_p10  ;;  %p4188_p12 = scmp.lt.s32.totalorder %s4186_s9, %s4179_s14 }
  0x30   : > { %p4189_p0 = por %p4188_p12, %p4187_p3 }
  0x32   : > { %p4190_p1 = pnand %p4189_p0, %p4183_p11 }
  0x34   : > { %4193 = shalt.err (!%p4190_p1)
}
  0x35   : > { %s4409_s30 = smov 64   ;;  %s4410_s8 = smov 4  }
  0x36   : > { %3774 = dma.hbm_to_vmem [thread:$0]  (!%p4561_p6), %s172_s13, 1024, %s174_s15, %s163_s10, %s4409_s30, %s4409_s30, %s4410_s8  }
  0x37   : > { %p2878_p2 = scmp.ge.s32.totalorder %s4406_s28, 1  ;;  %p208_p5 = scmp.lt.s32.totalorder %s4406_s28, 7 }
  0x38   : > { %s5638_s14 = sshll.u32 %s4402_s27, 10  ;;  %s187_s23 = scalar_lea.vmem [#allocation8], %s2872_s7 }
  0x39   : > { %p4575_p9 = pnand %p2878_p2, %p208_p5  ;;  %s193_s2 = scalar_lea.hbm %s5603_s3, %s5638_s14 }
  0x3a   : > { %s194_s12 = sshll.u32 %s187_s23, 4  ;;  %s184_s20 = scalar_lea.sflag [#allocation9], %s4550_s29  ;;  %s195_s12 = int_to_ptr.vmem [resolvable:$true] %s194_s12 }
  0x3b   : > { %s4207_s21 = scalar_lea.vmem %s195_s12, 1024  ;;  %s4411_s13 = smov [#allocation8]  }
  0x3c   : > { %p4208_p10 = scmp.ne.s32.totalorder %s195_s12, %s4207_s21  ;;  %s4212_s15 = sshll.u32 %s4411_s13, 4  ;;  %s4213_s15 = int_to_ptr.vmem [resolvable:$false] %s4212_s15 }
  0x3d   : > { %s4214_s10 = scalar_lea.vmem %s4213_s15, 2048  ;;  %p4215_p12 = scmp.lt.s32.totalorder %s195_s12, %s4213_s15 }
  0x3e   : > { %p4210_p11 = pnand %p4208_p10, %p4168_p7  ;;  %p4216_p0 = scmp.lt.s32.totalorder %s4214_s10, %s4207_s21 }
  0x40   : > { %p4211_p3 = pneg %p4210_p11  ;;  %p4217_p1 = por %p4216_p0, %p4215_p12 }
  0x42   : > { %p4218_p2 = pnand %p4217_p1, %p4211_p3 }
  0x44   : > { %4221 = shalt.err (!%p4218_p2)
}
  0x45   : > { %3777 = dma.hbm_to_vmem [thread:$0]  (!%p4561_p6), %s193_s2, 1024, %s195_s12, %s184_s20, %s4409_s30, %s4409_s30, %s4410_s8  }
  0x46   : > { %212 = sbr.rel (%p4575_p9) target bundleno = 1141 (0x475), region = 32  ;;  %s214_s23 = sand.u32 (!%p4575_p9), 1, %s4382_s22  }
  0x47   : > { %s2879_s7 = sshll.u32 (!%p4575_p9), %s214_s23, 6  ;;  %s215_s29 = scalar_lea.sflag (!%p4575_p9), [#allocation6], %s214_s23 }
  0x48   : > { %s4593_s14 = scalar_lea.vmem (!%p4575_p9), [#allocation5], %s2879_s7 }
  0x4b   : > { %4345 = dma.done.wait (%p4521_p8), %s215_s29, 1024  }
  0x4c   : > { %4347 = vsyncadd (%p4521_p8), %s215_s29, 4294966272  ;;  %s224_s21 = scalar_lea.sflag [#allocation9], %s214_s23  ;;  %s4599_s6 = scalar_lea.vmem [#allocation8], %s2879_s7 }
  0x4d   : > { %4349 = dma.done.wait (%p4521_p8), %s224_s21, 1024  }
  0x4e   : > { %4351 = vsyncadd (%p4521_p8), %s224_s21, 4294966272  ;;  %s255_s2 = sand.u32 1, %s4370_s19   ;;  %p258_p6 = scmp.lt.s32.totalorder %s4394_s25, 2 }
  0x4f   : > { %s4609_s20 = sshll.u32 %s255_s2, 8  ;;  %s2882_s12 = sshll.u32 %s4390_s24, 8 }
  0x50   : > { %p266_p7 = scmp.eq.s32.totalorder %s4394_s25, 0  ;;  %p267_p5 = scmp.eq.s32.totalorder %s4390_s24, 0 }
  0x51   : > { %s4614_s8 = scalar_select %p258_p6, %s4394_s25, 2 }
  0x52   : > { %s4412_s26 = smov [#allocation2]   ;;  %p4621_p8 = pnand %p267_p5, %p266_p7 }
  0x53   : > { %s260_s30 = scalar_lea.vmem %s5604_s4, %s4614_s8  ;;  %s279_s9 = sshll.u32 %s4412_s26, 4  ;;  %s280_s9 = int_to_ptr.vmem [resolvable:$true] %s279_s9 }
  0x54   : > { %p4627_p9 = pneg %p4621_p8  ;;  %s4413_s10 = smov [#allocation3 + $0x100]  }
  0x55   : > { %s292_s23 = sshll.u32 %s4413_s10, 4  ;;  %s4233_s7 = scalar_lea.vmem %s280_s9, 16384  ;;  %s293_s23 = int_to_ptr.vmem [resolvable:$true] %s292_s23 }
  0x56   : > { %p4234_p10 = scmp.ne.s32.totalorder %s280_s9, %s4233_s7  ;;  %p4241_p12 = scmp.lt.s32.totalorder %s280_s9, %s280_s9 }
  0x57   : > { %p4242_p0 = scmp.lt.s32.totalorder %s4233_s7, %s4233_s7 }
  0x58   : > { %p4236_p11 = pnand %p4234_p10, %p4627_p9 }
  0x59   : > { %p4243_p1 = por %p4242_p0, %p4241_p12 }
  0x5a   : > { %p4237_p3 = pneg %p4236_p11 }
  0x5c   : > { %p4244_p2 = pnand %p4243_p1, %p4237_p3 }
  0x5e   : > { %4247 = shalt.err (!%p4244_p2)  }
  0x5f   : > { %3765 = dma.hbm_to_vmem [thread:$0]  (!%p4621_p8), %s5600_s0, 16384, %s280_s9, [#allocation4] }
  0x60   : > { %s4259_s11 = scalar_lea.vmem %s293_s23, 4096  ;;  %s4414_s17 = smov [#allocation3]  }
  0x61   : > { %p4260_p6 = scmp.ne.s32.totalorder %s293_s23, %s4259_s11  ;;  %s4264_s26 = sshll.u32 %s4414_s17, 4  ;;  %s4265_s26 = int_to_ptr.vmem [resolvable:$false] %s4264_s26 }
  0x62   : > { %s4266_s10 = scalar_lea.vmem %s4265_s26, 8192  ;;  %p4267_p10 = scmp.lt.s32.totalorder %s293_s23, %s4265_s26 }
  0x63   : > { %p4262_p7 = pnand %p4260_p6, %p4627_p9  ;;  %p4268_p11 = scmp.lt.s32.totalorder %s4266_s10, %s4259_s11 }
  0x65   : > { %p4263_p5 = pneg %p4262_p7  ;;  %p4269_p3 = por %p4268_p11, %p4267_p10 }
  0x67   : > { %p4270_p12 = pnand %p4269_p3, %p4263_p5 }
  0x69   : > { %4273 = shalt.err (!%p4270_p12)  }
  0x6a   : > { %3766 = dma.hbm_to_vmem [thread:$0]  (!%p4621_p8), %s5601_s1, 4096, %s293_s23, [#allocation4 + $0x1] }
  0x6b   : > { %s4646_s9 = scalar_lea.vmem [#allocation10], %s4609_s20 }
  0x6c   : > { %4353 = dma.done.wait (%p4627_p9), [#allocation4], 16384 }
  0x6d   : > { %4355 = vsyncadd (%p4627_p9), [#allocation4], 4294950912 }
  0x6e   : > { %4357 = dma.done.wait (%p4627_p9), [#allocation4 + $0x1], 4096 }
  0x6f   : > { %4359 = vsyncadd (%p4627_p9), [#allocation4 + $0x1], 4294963200  ;;  %s303_s13 = sadd.s32 1, %s4394_s25  ;;  %s4659_s21 = sshra.s32 %s2882_s12, 3  ;;  %v4006_v55 = vld [vmem:[%s4599_s6 + $0x38] sm:$0xff]   ;;  %v4008_v59 = vld [vmem:[%s4599_s6 + $0x30] sm:$0xff]  }
  0x70   : > { %p304_p8 = scmp.lt.s32.totalorder %s303_s13, 0  ;;  %s305_s20 = ssub.s32 0, %s303_s13  ;;  %v4007_v58 = vld [vmem:[%s4593_s14 + $0x38] sm:$0xff]   ;;  %v4009_v60 = vld [vmem:[%s4593_s14 + $0x30] sm:$0xff]   ;;  %v4010_v62 = vld [vmem:[%s4599_s6 + $0x28] sm:$0xff]  }
  0x71   : > { %s2883_s23 = smin.u32 %s305_s20, %s303_s13  ;;  %s3135_s11 = sshll.u32 %s4659_s21, 4  ;;  %v4011_v63 = vld [vmem:[%s4593_s14 + $0x28] sm:$0xff]  }
  0x72   : > { %s307_s17 = sand.u32 1, %s2883_s23   ;;  %s4662_s7 = scalar_lea.vmem [#allocation2], %s3135_s11 }
  0x73   : > { %s308_s26 = ssub.s32 0, %s307_s17  ;;  %v3912_v0 = vld [vmem:[%s4662_s7 + $0x4] ss:$16 sps:$4 sm:$0xff]   ;;  %v3915_v1 = vld [vmem:[%s4662_s7 + $0xc] ss:$16 sps:$4 sm:$0xff]   ;;  %p3020_p9 = scmp.ge.s32.totalorder %s4394_s25, 2 }
  0x74   : > { %s5679_s26 = smov (!%p304_p8, %s308_s26), %s307_s17  ;;  %1031 = vmatprep.mubr.bf16.mxu0 %v3912_v0  ;;  %1192 = vmatprep.mubr.bf16.mxu1 %v3915_v1  ;;  %v3910_v32 = vld [vmem:[%s4662_s7] ss:$16 sps:$4 sm:$0xff]   ;;  %v3913_v34 = vld [vmem:[%s4662_s7 + $0x8] ss:$16 sps:$4 sm:$0xff]   ;;  %v3916_v36 = vld [vmem:[%s4662_s7 + $0x24] ss:$16 sps:$4 sm:$0xff]  }
  0x75   : > { %p2885_p0 = scmp.lt.s32.totalorder %s5679_s26, 0  ;;  %s314_s10 = sadd.s32 2, %s5679_s26  ;;  %v3918_v37 = vld [vmem:[%s4662_s7 + $0x2c] ss:$16 sps:$4 sm:$0xff]   ;;  %v3920_v38 = vld [vmem:[%s4662_s7 + $0x20] ss:$16 sps:$4 sm:$0xff]  }
  0x76   : > { %v3921_v39 = vld [vmem:[%s4662_s7 + $0x28] ss:$16 sps:$4 sm:$0xff]   ;;  %v3922_v40 = vld [vmem:[%s4662_s7 + $0x44] ss:$16 sps:$4 sm:$0xff]   ;;  %v3924_v41 = vld [vmem:[%s4662_s7 + $0x4c] ss:$16 sps:$4 sm:$0xff]  }
  0x77   : > { %s5681_s10 = smov (!%p2885_p0, %s314_s10), %s5679_s26  ;;  %v3926_v42 = vld [vmem:[%s4662_s7 + $0x40] ss:$16 sps:$4 sm:$0xff]   ;;  %v3927_v43 = vld [vmem:[%s4662_s7 + $0x48] ss:$16 sps:$4 sm:$0xff]   ;;  %v3928_v44 = vld [vmem:[%s4662_s7 + $0x64] ss:$16 sps:$4 sm:$0xff]  }
  0x78   : > { %s3134_s12 = sshll.u32 %s5681_s10, 8  ;;  %v3930_v45 = vld [vmem:[%s4662_s7 + $0x6c] ss:$16 sps:$4 sm:$0xff]   ;;  %v3932_v46 = vld [vmem:[%s4662_s7 + $0x60] ss:$16 sps:$4 sm:$0xff]   ;;  %s2886_s29 = sshll.u32 %s5681_s10, 6 }
  0x79   : > { %s4669_s15 = scalar_lea.vmem [#allocation3], %s3134_s12  ;;  %v3933_v47 = vld [vmem:[%s4662_s7 + $0x68] ss:$16 sps:$4 sm:$0xff]   ;;  %v3934_v48 = vld [vmem:[%s4662_s7 + $0x84] ss:$16 sps:$4 sm:$0xff]   ;;  %s385_s13 = sadd.s32 %s2886_s29, %s4659_s21 }
  0x7a   : > { %v3878_v2 = vld [vmem:[%s4669_s15 + $0x78] sm:$0xff]   ;;  %v3882_v6 = vld [vmem:[%s4669_s15 + $0x70] sm:$0xff]   ;;  %v3886_v10 = vld [vmem:[%s4669_s15 + $0x68] sm:$0xff]   ;;  %s2888_s20 = sshll.u32 %s385_s13, 2  ;;  %p1974_p1 = scmp.lt.s32.totalorder (!%p3020_p9), %s4394_s25, 0 }
  0x7b   : > { %v3879_v3 = vld [vmem:[%s4669_s15 + $0xf8] sm:$0xff]   ;;  %3392 = vmatprep.subr.bf16.mxu0 %v3878_v2  ;;  %v3883_v7 = vld [vmem:[%s4669_s15 + $0xf0] sm:$0xff]   ;;  %v3887_v11 = vld [vmem:[%s4669_s15 + $0xe8] sm:$0xff]   ;;  %s4768_s23 = scalar_lea.vmem [#allocation3], %s2888_s20  ;;  %s1975_s8 = ssub.s32 (!%p3020_p9), 0, %s4394_s25 }
  0x7c   : > { %v3880_v4 = vld [vmem:[%s4669_s15 + $0x38] sm:$0xff]   ;;  %3504 = vmatprep.subr.bf16.mxu1 %v3879_v3  ;;  %v3884_v8 = vld [vmem:[%s4669_s15 + $0x30] sm:$0xff]   ;;  %v3888_v12 = vld [vmem:[%s4669_s15 + $0x28] sm:$0xff]  }
  0x7d   : > { %v3881_v5 = vld [vmem:[%s4669_s15 + $0xb8] sm:$0xff]   ;;  %3393 = vmatpush3.bf16.msra.mxu0 %v3880_v4  ;;  %v3885_v9 = vld [vmem:[%s4669_s15 + $0xb0] sm:$0xff]   ;;  %v3889_v13 = vld [vmem:[%s4669_s15 + $0xa8] sm:$0xff]  }
  0x7e   : > { %3505 = vmatpush3.bf16.msra.mxu1 %v3881_v5  ;;  %3394 = vmatprep.subr.bf16.mxu0 %v3882_v6  ;;  %v3890_v14 = vld [vmem:[%s4669_s15 + $0x60] sm:$0xff]   ;;  %v3894_v18 = vld [vmem:[%s4669_s15 + $0x58] sm:$0xff]   ;;  %v3898_v22 = vld [vmem:[%s4669_s15 + $0x50] sm:$0xff]  }
  0x7f   : > { %3506 = vmatprep.subr.bf16.mxu1 %v3883_v7  ;;  %v3891_v15 = vld [vmem:[%s4669_s15 + $0xe0] sm:$0xff]   ;;  %v3895_v19 = vld [vmem:[%s4669_s15 + $0xd8] sm:$0xff]   ;;  %v3899_v23 = vld [vmem:[%s4669_s15 + $0xd0] sm:$0xff]  }
  0x80   : > { %v3892_v16 = vld [vmem:[%s4669_s15 + $0x20] sm:$0xff]   ;;  %v3896_v20 = vld [vmem:[%s4669_s15 + $0x18] sm:$0xff]   ;;  %v3900_v24 = vld [vmem:[%s4669_s15 + $0x10] sm:$0xff]  }
  0x81   : > { %3395 = vmatpush3.bf16.msra.mxu0 %v3884_v8  ;;  %v3893_v17 = vld [vmem:[%s4669_s15 + $0xa0] sm:$0xff]   ;;  %v3897_v21 = vld [vmem:[%s4669_s15 + $0x98] sm:$0xff]   ;;  %v3901_v25 = vld [vmem:[%s4669_s15 + $0x90] sm:$0xff]  }
  0x82   : > { %3507 = vmatpush3.bf16.msra.mxu1 %v3885_v9  ;;  %3396 = vmatprep.subr.bf16.mxu0 %v3886_v10  ;;  %v3902_v26 = vld [vmem:[%s4669_s15 + $0x48] sm:$0xff]   ;;  %v3906_v30 = vld [vmem:[%s4669_s15 + $0x40] sm:$0xff]  }
  0x83   : > { %3508 = vmatprep.subr.bf16.mxu1 %v3887_v11  ;;  %v3903_v27 = vld [vmem:[%s4669_s15 + $0xc8] sm:$0xff]   ;;  %v3907_v31 = vld [vmem:[%s4669_s15 + $0xc0] sm:$0xff]  }
  0x84   : > { %v3904_v28 = vld [vmem:[%s4669_s15 + $0x8] sm:$0xff]   ;;  %v3908_v33 = vld [vmem:[%s4669_s15] sm:$0xff]  }
  0x85   : > { %3397 = vmatpush3.bf16.msra.mxu0 %v3888_v12  ;;  %v3905_v29 = vld [vmem:[%s4669_s15 + $0x88] sm:$0xff]   ;;  %v3909_v35 = vld [vmem:[%s4669_s15 + $0x80] sm:$0xff]  }
  0x86   : > { %3509 = vmatpush3.bf16.msra.mxu1 %v3889_v13  ;;  %3398 = vmatprep.subr.bf16.mxu0 %v3890_v14  ;;  %v3936_v49 = vld [vmem:[%s4662_s7 + $0x8c] ss:$16 sps:$4 sm:$0xff]   ;;  %v3938_v50 = vld [vmem:[%s4662_s7 + $0x80] ss:$16 sps:$4 sm:$0xff]   ;;  %v3939_v51 = vld [vmem:[%s4662_s7 + $0x88] ss:$16 sps:$4 sm:$0xff]  }
  0x87   : > { %3510 = vmatprep.subr.bf16.mxu1 %v3891_v15  ;;  %v3940_v52 = vld [vmem:[%s4662_s7 + $0xa4] ss:$16 sps:$4 sm:$0xff]   ;;  %v3942_v53 = vld [vmem:[%s4662_s7 + $0xac] ss:$16 sps:$4 sm:$0xff]   ;;  %v3944_v54 = vld [vmem:[%s4662_s7 + $0xa0] ss:$16 sps:$4 sm:$0xff]  }
  0x88   : > { %v3945_v56 = vld [vmem:[%s4662_s7 + $0xa8] ss:$16 sps:$4 sm:$0xff]   ;;  %v3946_v57 = vld [vmem:[%s4662_s7 + $0xc4] ss:$16 sps:$4 sm:$0xff]   ;;  %v3948_v61 = vld [vmem:[%s4662_s7 + $0xcc] ss:$16 sps:$4 sm:$0xff]  }
  0x89   : > { %3399 = vmatpush3.bf16.msra.mxu0 %v3892_v16  ;;  %v4012_v0 = vld [vmem:[%s4599_s6 + $0x20] sm:$0xff]   ;;  %v3951_v3 = vld [vmem:[%s4662_s7 + $0xc8] ss:$16 sps:$4 sm:$0xff]   ;;  %v3954_v5 = vld [vmem:[%s4662_s7 + $0xec] ss:$16 sps:$4 sm:$0xff]  }
  0x8a   : > { %3511 = vmatpush3.bf16.msra.mxu1 %v3893_v17  ;;  %3400 = vmatprep.subr.bf16.mxu0 %v3894_v18  ;;  %v3950_v1 = vld [vmem:[%s4662_s7 + $0xc0] ss:$16 sps:$4 sm:$0xff]   ;;  %v3952_v4 = vld [vmem:[%s4662_s7 + $0xe4] ss:$16 sps:$4 sm:$0xff]   ;;  %v3957_v7 = vld [vmem:[%s4662_s7 + $0xe8] ss:$16 sps:$4 sm:$0xff]  }
  0x8b   : > { %3512 = vmatprep.subr.bf16.mxu1 %v3895_v19  ;;  %v4013_v2 = vld [vmem:[%s4593_s14 + $0x20] sm:$0xff]   ;;  %v3960_v9 = vld [vmem:[%s4662_s7 + $0x10c] ss:$16 sps:$4 sm:$0xff]   ;;  %v3963_v11 = vld [vmem:[%s4662_s7 + $0x108] ss:$16 sps:$4 sm:$0xff]  }
  0x8c   : > { %v3956_v6 = vld [vmem:[%s4662_s7 + $0xe0] ss:$16 sps:$4 sm:$0xff]   ;;  %v3958_v8 = vld [vmem:[%s4662_s7 + $0x104] ss:$16 sps:$4 sm:$0xff]   ;;  %v3966_v13 = vld [vmem:[%s4662_s7 + $0x12c] ss:$16 sps:$4 sm:$0xff]  }
  0x8d   : > { %3401 = vmatpush3.bf16.msra.mxu0 %v3896_v20  ;;  %v3962_v10 = vld [vmem:[%s4662_s7 + $0x100] ss:$16 sps:$4 sm:$0xff]   ;;  %v3964_v12 = vld [vmem:[%s4662_s7 + $0x124] ss:$16 sps:$4 sm:$0xff]   ;;  %v4014_v15 = vld [vmem:[%s4599_s6 + $0x18] sm:$0xff]  }
  0x8e   : > { %3513 = vmatpush3.bf16.msra.mxu1 %v3897_v21  ;;  %3402 = vmatprep.subr.bf16.mxu0 %v3898_v22  ;;  %v3968_v14 = vld [vmem:[%s4662_s7 + $0x120] ss:$16 sps:$4 sm:$0xff]   ;;  %v4015_v16 = vld [vmem:[%s4593_s14 + $0x18] sm:$0xff]   ;;  %v3970_v18 = vld [vmem:[%s4662_s7 + $0x144] ss:$16 sps:$4 sm:$0xff]  }
  0x8f   : > { %3514 = vmatprep.subr.bf16.mxu1 %v3899_v23  ;;  %v3969_v17 = vld [vmem:[%s4662_s7 + $0x128] ss:$16 sps:$4 sm:$0xff]   ;;  %v3972_v19 = vld [vmem:[%s4662_s7 + $0x14c] ss:$16 sps:$4 sm:$0xff]   ;;  %v4016_v20 = vld [vmem:[%s4599_s6 + $0x10] sm:$0xff]  }
  0x90   : > { %v4017_v21 = vld [vmem:[%s4593_s14 + $0x10] sm:$0xff]   ;;  %v4018_v23 = vld [vmem:[%s4599_s6 + $0x8] sm:$0xff]  }
  0x91   : > { %3403 = vmatpush3.bf16.msra.mxu0 %v3900_v24  ;;  %v3974_v22 = vld [vmem:[%s4662_s7 + $0x140] ss:$16 sps:$4 sm:$0xff]   ;;  %v4019_v24 = vld [vmem:[%s4593_s14 + $0x8] sm:$0xff]  }
  0x92   : > { %3515 = vmatpush3.bf16.msra.mxu1 %v3901_v25  ;;  %3404 = vmatprep.subr.bf16.mxu0 %v3902_v26  ;;  %v3975_v25 = vld [vmem:[%s4662_s7 + $0x148] ss:$16 sps:$4 sm:$0xff]   ;;  %v3976_v26 = vld [vmem:[%s4662_s7 + $0x164] ss:$16 sps:$4 sm:$0xff]  }
  0x93   : > { %3516 = vmatprep.subr.bf16.mxu1 %v3903_v27  ;;  %v3978_v27 = vld [vmem:[%s4662_s7 + $0x16c] ss:$16 sps:$4 sm:$0xff]  }
  0x95   : > { %3405 = vmatpush3.bf16.msra.mxu0 %v3904_v28  ;;  %v4020_v28 = vld [vmem:[%s4599_s6] sm:$0xff]  }
  0x96   : > { %3517 = vmatpush3.bf16.msra.mxu1 %v3905_v29  ;;  %3406 = vmatprep.subr.bf16.mxu0 %v3906_v30  ;;  %v4021_v29 = vld [vmem:[%s4593_s14] sm:$0xff]  }
  0x97   : > { %3518 = vmatprep.subr.bf16.mxu1 %v3907_v31  ;;  %v3980_v30 = vld [vmem:[%s4662_s7 + $0x160] ss:$16 sps:$4 sm:$0xff]   ;;  %v3981_v31 = vld [vmem:[%s4662_s7 + $0x168] ss:$16 sps:$4 sm:$0xff]  }
  0x99   : > { %3407 = vmatpush3.bf16.msra.mxu0 %v3908_v33  ;;  %v3984_v33 = vld [vmem:[%s4662_s7 + $0x18c] ss:$16 sps:$4 sm:$0xff]  }
  0x9a   : > { %3519 = vmatpush3.bf16.msra.mxu1 %v3909_v35  ;;  %3664 = vmatprep.subr.bf16.mxu0 %v4006_v55  ;;  %v3987_v35 = vld [vmem:[%s4662_s7 + $0x188] ss:$16 sps:$4 sm:$0xff]  }
  0x9b   : > { %3712 = vmatprep.subr.bf16.mxu1 %v4007_v58 }
  0x9c   : > { %1032 = vmatmul.mubr.bf16.vlgmr.msra.gmra.mxu0 %v3910_v32  ;;  %v3982_v32 = vld [vmem:[%s4662_s7 + $0x184] ss:$16 sps:$4 sm:$0xff]  }
  0x9d   : > { %1193 = vmatmul.mubr.bf16.vlgmr.msra.gmra.mxu1 %v3913_v34  ;;  %1039 = vmatprep.mubr.bf16.mxu0 %v3916_v36  ;;  %v3986_v34 = vld [vmem:[%s4662_s7 + $0x180] ss:$16 sps:$4 sm:$0xff]   ;;  %v3988_v36 = vld [vmem:[%s4662_s7 + $0x1a4] ss:$16 sps:$4 sm:$0xff]  }
  0x9e   : > { %1200 = vmatprep.mubr.bf16.mxu1 %v3918_v37  ;;  %3665 = vmatpush3.bf16.msra.mxu0 %v4006_v55  ;;  %v3990_v37 = vld [vmem:[%s4662_s7 + $0x1ac] ss:$16 sps:$4 sm:$0xff]  }
  0x9f   : > { %3713 = vmatpush3.bf16.msra.mxu1 %v4007_v58  ;;  %3666 = vmatprep.subr.bf16.mxu0 %v4008_v59  ;;  %v4029_v55 = vld [vmem:[%s4768_s23 + $0x38] sm:$0xff]   ;;  %v4032_v58 = vld [vmem:[%s4768_s23 + $0x50] sm:$0xff]  }
  0xa0   : > { %3714 = vmatprep.subr.bf16.mxu1 %v4009_v60 }
  0xa2   : > { %3667 = vmatpush3.bf16.msra.mxu0 %v4008_v59  ;;  %v4033_v59 = vld [vmem:[%s4768_s23 + $0x58] sm:$0xff]  }
  0xa3   : > { %3715 = vmatpush3.bf16.msra.mxu1 %v4009_v60  ;;  %3668 = vmatprep.subr.bf16.mxu0 %v4010_v62  ;;  %v4034_v60 = vld [vmem:[%s4768_s23 + $0x60] sm:$0xff]  }
  0xa4   : > { %1040 = vmatmul.mubr.bf16.gmra.mxu0 %v3920_v38  ;;  %3716 = vmatprep.subr.bf16.mxu1 %v4011_v63  ;;  %v3992_v38 = vld [vmem:[%s4662_s7 + $0x1a0] ss:$16 sps:$4 sm:$0xff]  }
  0xa5   : > { %1201 = vmatmul.mubr.bf16.gmra.mxu1 %v3921_v39  ;;  %1047 = vmatprep.mubr.bf16.mxu0 %v3922_v40  ;;  %v3993_v39 = vld [vmem:[%s4662_s7 + $0x1a8] ss:$16 sps:$4 sm:$0xff]   ;;  %v3994_v40 = vld [vmem:[%s4662_s7 + $0x1c4] ss:$16 sps:$4 sm:$0xff]  }
  0xa6   : > { %1208 = vmatprep.mubr.bf16.mxu1 %v3924_v41  ;;  %3669 = vmatpush3.bf16.msra.mxu0 %v4010_v62  ;;  %v3996_v41 = vld [vmem:[%s4662_s7 + $0x1cc] ss:$16 sps:$4 sm:$0xff]   ;;  %v4036_v62 = vld [vmem:[%s4768_s23 + $0x70] sm:$0xff]  }
  0xa7   : > { %3717 = vmatpush3.bf16.msra.mxu1 %v4011_v63  ;;  %3670 = vmatprep.subr.bf16.mxu0 %v4012_v0  ;;  %v4037_v63 = vld [vmem:[%s4768_s23 + $0x78] sm:$0xff]  }
  0xa8   : > { %3718 = vmatprep.subr.bf16.mxu1 %v4013_v2 }
  0xaa   : > { %3671 = vmatpush3.bf16.msra.mxu0 %v4012_v0 }
  0xab   : > { %3719 = vmatpush3.bf16.msra.mxu1 %v4013_v2  ;;  %3672 = vmatprep.subr.bf16.mxu0 %v4014_v15 }
  0xac   : > { %1048 = vmatmul.mubr.bf16.gmra.mxu0 %v3926_v42  ;;  %3720 = vmatprep.subr.bf16.mxu1 %v4015_v16  ;;  %v3998_v42 = vld [vmem:[%s4662_s7 + $0x1c0] ss:$16 sps:$4 sm:$0xff]  }
  0xad   : > { %1209 = vmatmul.mubr.bf16.gmra.mxu1 %v3927_v43  ;;  %1055 = vmatprep.mubr.bf16.mxu0 %v3928_v44  ;;  %v3999_v43 = vld [vmem:[%s4662_s7 + $0x1c8] ss:$16 sps:$4 sm:$0xff]   ;;  %v4000_v44 = vld [vmem:[%s4662_s7 + $0x1e4] ss:$16 sps:$4 sm:$0xff]  }
  0xae   : > { %1216 = vmatprep.mubr.bf16.mxu1 %v3930_v45  ;;  %3673 = vmatpush3.bf16.msra.mxu0 %v4014_v15  ;;  %v4002_v45 = vld [vmem:[%s4662_s7 + $0x1ec] ss:$16 sps:$4 sm:$0xff]  }
  0xaf   : > { %3721 = vmatpush3.bf16.msra.mxu1 %v4015_v16  ;;  %3674 = vmatprep.subr.bf16.mxu0 %v4016_v20 }
  0xb0   : > { %3722 = vmatprep.subr.bf16.mxu1 %v4017_v21 }
  0xb2   : > { %3675 = vmatpush3.bf16.msra.mxu0 %v4016_v20 }
  0xb3   : > { %3723 = vmatpush3.bf16.msra.mxu1 %v4017_v21  ;;  %3676 = vmatprep.subr.bf16.mxu0 %v4018_v23 }
  0xb4   : > { %1056 = vmatmul.mubr.bf16.gmra.mxu0 %v3932_v46  ;;  %3724 = vmatprep.subr.bf16.mxu1 %v4019_v24  ;;  %v4004_v46 = vld [vmem:[%s4662_s7 + $0x1e0] ss:$16 sps:$4 sm:$0xff]  }
  0xb5   : > { %1217 = vmatmul.mubr.bf16.gmra.mxu1 %v3933_v47  ;;  %1063 = vmatprep.mubr.bf16.mxu0 %v3934_v48  ;;  %v4005_v47 = vld [vmem:[%s4662_s7 + $0x1e8] ss:$16 sps:$4 sm:$0xff]   ;;  %v4022_v48 = vld [vmem:[%s4768_s23] sm:$0xff]  }
  0xb6   : > { %1224 = vmatprep.mubr.bf16.mxu1 %v3936_v49  ;;  %3677 = vmatpush3.bf16.msra.mxu0 %v4018_v23  ;;  %v4023_v49 = vld [vmem:[%s4768_s23 + $0x8] sm:$0xff]  }
  0xb7   : > { %3725 = vmatpush3.bf16.msra.mxu1 %v4019_v24  ;;  %3678 = vmatprep.subr.bf16.mxu0 %v4020_v28 }
  0xb8   : > { %3726 = vmatprep.subr.bf16.mxu1 %v4021_v29 }
  0xba   : > { %3679 = vmatpush3.bf16.msra.mxu0 %v4020_v28 }
  0xbb   : > { %3727 = vmatpush3.bf16.msra.mxu1 %v4021_v29 }
  0xbc   : > { %1064 = vmatmul.mubr.bf16.gmra.mxu0 %v3938_v50  ;;  %v4024_v50 = vld [vmem:[%s4768_s23 + $0x10] sm:$0xff]  }
  0xbd   : > { %1225 = vmatmul.mubr.bf16.gmra.mxu1 %v3939_v51  ;;  %1071 = vmatprep.mubr.bf16.mxu0 %v3940_v52  ;;  %v4025_v51 = vld [vmem:[%s4768_s23 + $0x18] sm:$0xff]   ;;  %v4026_v52 = vld [vmem:[%s4768_s23 + $0x20] sm:$0xff]  }
  0xbe   : > { %1232 = vmatprep.mubr.bf16.mxu1 %v3942_v53  ;;  %v4027_v53 = vld [vmem:[%s4768_s23 + $0x28] sm:$0xff]  }
  0xc4   : > { %1072 = vmatmul.mubr.bf16.gmra.mxu0 %v3944_v54  ;;  %v4028_v54 = vld [vmem:[%s4768_s23 + $0x30] sm:$0xff]  }
  0xc5   : > { %1233 = vmatmul.mubr.bf16.gmra.mxu1 %v3945_v56  ;;  %1079 = vmatprep.mubr.bf16.mxu0 %v3946_v57  ;;  %v4030_v56 = vld [vmem:[%s4768_s23 + $0x40] sm:$0xff]   ;;  %v4031_v57 = vld [vmem:[%s4768_s23 + $0x48] sm:$0xff]  }
  0xc6   : > { %1240 = vmatprep.mubr.bf16.mxu1 %v3948_v61  ;;  %v4035_v61 = vld [vmem:[%s4768_s23 + $0x68] sm:$0xff]  }
  0xcc   : > { %1080 = vmatmul.mubr.bf16.gmra.mxu0 %v3950_v1 }
  0xcd   : > { %1241 = vmatmul.mubr.bf16.gmra.mxu1 %v3951_v3  ;;  %1087 = vmatprep.mubr.bf16.mxu0 %v3952_v4 }
  0xce   : > { %1248 = vmatprep.mubr.bf16.mxu1 %v3954_v5 }
  0xd4   : > { %1088 = vmatmul.mubr.bf16.gmra.mxu0 %v3956_v6 }
  0xd5   : > { %1249 = vmatmul.mubr.bf16.gmra.mxu1 %v3957_v7  ;;  %1095 = vmatprep.mubr.bf16.mxu0 %v3958_v8 }
  0xd6   : > { %1256 = vmatprep.mubr.bf16.mxu1 %v3960_v9 }
  0xdc   : > { %1096 = vmatmul.mubr.bf16.gmra.mxu0 %v3962_v10 }
  0xdd   : > { %1257 = vmatmul.mubr.bf16.gmra.mxu1 %v3963_v11  ;;  %1103 = vmatprep.mubr.bf16.mxu0 %v3964_v12 }
  0xde   : > { %1264 = vmatprep.mubr.bf16.mxu1 %v3966_v13 }
  0xe4   : > { %1104 = vmatmul.mubr.bf16.gmra.mxu0 %v3968_v14 }
  0xe5   : > { %1265 = vmatmul.mubr.bf16.gmra.mxu1 %v3969_v17  ;;  %1111 = vmatprep.mubr.bf16.mxu0 %v3970_v18 }
  0xe6   : > { %1272 = vmatprep.mubr.bf16.mxu1 %v3972_v19 }
  0xec   : > { %1112 = vmatmul.mubr.bf16.gmra.mxu0 %v3974_v22 }
  0xed   : > { %1273 = vmatmul.mubr.bf16.gmra.mxu1 %v3975_v25  ;;  %1119 = vmatprep.mubr.bf16.mxu0 %v3976_v26 }
  0xee   : > { %1280 = vmatprep.mubr.bf16.mxu1 %v3978_v27 }
  0xf4   : > { %1120 = vmatmul.mubr.bf16.gmra.mxu0 %v3980_v30 }
  0xf5   : > { %1281 = vmatmul.mubr.bf16.gmra.mxu1 %v3981_v31  ;;  %1127 = vmatprep.mubr.bf16.mxu0 %v3982_v32 }
  0xf6   : > { %1288 = vmatprep.mubr.bf16.mxu1 %v3984_v33 }
  0xfc   : > { %1128 = vmatmul.mubr.bf16.gmra.mxu0 %v3986_v34 }
  0xfd   : > { %1289 = vmatmul.mubr.bf16.gmra.mxu1 %v3987_v35  ;;  %1135 = vmatprep.mubr.bf16.mxu0 %v3988_v36 }
  0xfe   : > { %1296 = vmatprep.mubr.bf16.mxu1 %v3990_v37 }
 0x104   : > { %1136 = vmatmul.mubr.bf16.gmra.mxu0 %v3992_v38 }
 0x105   : > { %1297 = vmatmul.mubr.bf16.gmra.mxu1 %v3993_v39  ;;  %1143 = vmatprep.mubr.bf16.mxu0 %v3994_v40 }
 0x106   : > { %1304 = vmatprep.mubr.bf16.mxu1 %v3996_v41 }
 0x10c   : > { %1144 = vmatmul.mubr.bf16.gmra.mxu0 %v3998_v42 }
 0x10d   : > { %1305 = vmatmul.mubr.bf16.gmra.mxu1 %v3999_v43  ;;  %1151 = vmatprep.mubr.bf16.mxu0 %v4000_v44 }
 0x10e   : > { %1312 = vmatprep.mubr.bf16.mxu1 %v4002_v45 }
 0x114   : > { %1152 = vmatmul.mubr.bf16.gmra.mxu0 %v4004_v46 }
 0x115   : > { %1313 = vmatmul.mubr.bf16.gmra.mxu1 %v4005_v47  ;;  %3680 = vmatprep.mubr.bf16.mxu0 %v4022_v48 }
 0x11c   : > { %3681 = vmatmul.mubr.bf16.vlgmr.msra.gmra.mxu0 %v4023_v49 }
 0x11d   : > { %3684 = vmatprep.mubr.bf16.mxu0 %v4024_v50 }
 0x124   : > { %3685 = vmatmul.mubr.bf16.gmra.mxu0 %v4025_v51 }
 0x125   : > { %3688 = vmatprep.mubr.bf16.mxu0 %v4026_v52 }
 0x12c   : > { %3689 = vmatmul.mubr.bf16.gmra.mxu0 %v4027_v53 }
 0x12d   : > { %3692 = vmatprep.mubr.bf16.mxu0 %v4028_v54 }
 0x134   : > { %3693 = vmatmul.mubr.bf16.gmra.mxu0 %v4029_v55 }
 0x135   : > { %3696 = vmatprep.mubr.bf16.mxu0 %v4030_v56 }
 0x13c   : > { %3697 = vmatmul.mubr.bf16.gmra.mxu0 %v4031_v57 }
 0x13d   : > { %3700 = vmatprep.mubr.bf16.mxu0 %v4032_v58 }
 0x144   : > { %3701 = vmatmul.mubr.bf16.gmra.mxu0 %v4033_v59 }
 0x145   : > { %3704 = vmatprep.mubr.bf16.mxu0 %v4034_v60 }
 0x14c   : > { %3705 = vmatmul.mubr.bf16.gmra.mxu0 %v4035_v61 }
 0x14d   : > { %3708 = vmatprep.mubr.bf16.mxu0 %v4036_v62 }
 0x154   : > { %3709 = vmatmul.mubr.bf16.gmra.mxu0 %v4037_v63 }
 0x15c   : > { %v3408_v0 = vpop.f32.mrf.mxu0 }
 0x15d   : > { %v3520_v1 = vpop.f32.mrf.mxu1 }
 0x15e   : > { %v3409_v2 = vpop.f32.mrf.mxu0 }
 0x15f   : > { %v3521_v3 = vpop.f32.mrf.mxu1  ;;  %v3410_v6 = vadd.f32 %v3409_v2, %v3408_v0 }
 0x160   : > { %v3411_v4 = vpop.f32.mrf.mxu0  ;;  %v3522_v7 = vadd.f32 %v3521_v3, %v3520_v1 }
 0x161   : > { %v3523_v5 = vpop.f32.mrf.mxu1 }
 0x162   : > { %v3412_v8 = vpop.f32.mrf.mxu0  ;;  %v1195_v14 = vadd.f32 %v3522_v7, %v3410_v6 }
 0x163   : > { %v3413_v9 = vadd.f32 %v3412_v8, %v3411_v4  ;;  %v3524_v10 = vpop.f32.mrf.mxu1 }
 0x164   : > { %v3525_v11 = vadd.f32 %v3524_v10, %v3523_v5  ;;  %v3414_v12 = vpop.f32.mrf.mxu0 }
 0x165   : > { %v3526_v13 = vpop.f32.mrf.mxu1 }
 0x166   : > { %v1198_v15 = vadd.f32 %v3525_v11, %v3413_v9  ;;  %v3415_v16 = vpop.f32.mrf.mxu0 }
 0x167   : > { %v3527_v17 = vpop.f32.mrf.mxu1  ;;  %v3416_v21 = vadd.f32 %v3415_v16, %v3414_v12 }
 0x168   : > { %v3417_v18 = vpop.f32.mrf.mxu0  ;;  %v1321_v19 = vpack.c.bf16 %v1198_v15, %v1195_v14  ;;  %v3528_v22 = vadd.f32 %v3527_v17, %v3526_v13 }
 0x169   : > { %v3529_v20 = vpop.f32.mrf.mxu1 }
 0x16a   : > { %3728 = vmatprep.mubr.bf16.mxu1 %v1321_v19  ;;  %v3418_v23 = vpop.f32.mrf.mxu0  ;;  %v1203_v29 = vadd.f32 %v3528_v22, %v3416_v21 }
 0x16b   : > { %v3419_v24 = vadd.f32 %v3418_v23, %v3417_v18  ;;  %v3530_v25 = vpop.f32.mrf.mxu1 }
 0x16c   : > { %v3531_v26 = vadd.f32 %v3530_v25, %v3529_v20  ;;  %v3420_v27 = vpop.f32.mrf.mxu0 }
 0x16d   : > { %v3532_v28 = vpop.f32.mrf.mxu1 }
 0x16e   : > { %v1206_v30 = vadd.f32 %v3531_v26, %v3419_v24  ;;  %v3421_v31 = vpop.f32.mrf.mxu0 }
 0x16f   : > { %v3533_v32 = vpop.f32.mrf.mxu1  ;;  %v3422_v36 = vadd.f32 %v3421_v31, %v3420_v27 }
 0x170   : > { %v1322_v33 = vpack.c.bf16 %v1206_v30, %v1203_v29  ;;  %v3423_v34 = vpop.f32.mrf.mxu0  ;;  %v3534_v37 = vadd.f32 %v3533_v32, %v3532_v28 }
 0x171   : > { %v3535_v35 = vpop.f32.mrf.mxu1 }
 0x172   : > { %3729 = vmatmul.mubr.bf16.vlgmr.msra.gmra.mxu1 %v1322_v33  ;;  %v3424_v38 = vpop.f32.mrf.mxu0  ;;  %v1211_v44 = vadd.f32 %v3534_v37, %v3422_v36 }
 0x173   : > { %v3425_v39 = vadd.f32 %v3424_v38, %v3423_v34  ;;  %v3536_v40 = vpop.f32.mrf.mxu1 }
 0x174   : > { %v3537_v41 = vadd.f32 %v3536_v40, %v3535_v35  ;;  %v3426_v42 = vpop.f32.mrf.mxu0 }
 0x175   : > { %v3538_v43 = vpop.f32.mrf.mxu1 }
 0x176   : > { %v1214_v45 = vadd.f32 %v3537_v41, %v3425_v39  ;;  %v3427_v46 = vpop.f32.mrf.mxu0 }
 0x177   : > { %v3539_v47 = vpop.f32.mrf.mxu1  ;;  %v3428_v51 = vadd.f32 %v3427_v46, %v3426_v42 }
 0x178   : > { %v3429_v48 = vpop.f32.mrf.mxu0  ;;  %v1323_v49 = vpack.c.bf16 %v1214_v45, %v1211_v44  ;;  %v3540_v52 = vadd.f32 %v3539_v47, %v3538_v43 }
 0x179   : > { %v3541_v50 = vpop.f32.mrf.mxu1 }
 0x17a   : > { %3732 = vmatprep.mubr.bf16.mxu1 %v1323_v49  ;;  %v3430_v53 = vpop.f32.mrf.mxu0  ;;  %v1219_v59 = vadd.f32 %v3540_v52, %v3428_v51 }
 0x17b   : > { %v3431_v54 = vadd.f32 %v3430_v53, %v3429_v48  ;;  %v3542_v55 = vpop.f32.mrf.mxu1 }
 0x17c   : > { %v3543_v56 = vadd.f32 %v3542_v55, %v3541_v50  ;;  %v3432_v57 = vpop.f32.mrf.mxu0 }
 0x17d   : > { %v3544_v58 = vpop.f32.mrf.mxu1 }
 0x17e   : > { %v1222_v60 = vadd.f32 %v3543_v56, %v3431_v54  ;;  %v3433_v61 = vpop.f32.mrf.mxu0 }
 0x17f   : > { %v3545_v62 = vpop.f32.mrf.mxu1  ;;  %v3434_v2 = vadd.f32 %v3433_v61, %v3432_v57 }
 0x180   : > { %v3435_v63 = vpop.f32.mrf.mxu0  ;;  %v1324_v0 = vpack.c.bf16 %v1222_v60, %v1219_v59  ;;  %v3546_v3 = vadd.f32 %v3545_v62, %v3544_v58 }
 0x181   : > { %v3547_v1 = vpop.f32.mrf.mxu1 }
 0x182   : > { %3733 = vmatmul.mubr.bf16.gmra.mxu1 %v1324_v0  ;;  %v3436_v4 = vpop.f32.mrf.mxu0  ;;  %v1227_v10 = vadd.f32 %v3546_v3, %v3434_v2 }
 0x183   : > { %v3437_v5 = vadd.f32 %v3436_v4, %v3435_v63  ;;  %v3548_v6 = vpop.f32.mrf.mxu1 }
 0x184   : > { %v3549_v7 = vadd.f32 %v3548_v6, %v3547_v1  ;;  %v3438_v8 = vpop.f32.mrf.mxu0 }
 0x185   : > { %v3550_v9 = vpop.f32.mrf.mxu1 }
 0x186   : > { %v1230_v11 = vadd.f32 %v3549_v7, %v3437_v5  ;;  %v3439_v12 = vpop.f32.mrf.mxu0 }
 0x187   : > { %v3551_v13 = vpop.f32.mrf.mxu1  ;;  %v3440_v17 = vadd.f32 %v3439_v12, %v3438_v8 }
 0x188   : > { %v3441_v14 = vpop.f32.mrf.mxu0  ;;  %v1325_v15 = vpack.c.bf16 %v1230_v11, %v1227_v10  ;;  %v3552_v18 = vadd.f32 %v3551_v13, %v3550_v9 }
 0x189   : > { %v3553_v16 = vpop.f32.mrf.mxu1 }
 0x18a   : > { %3736 = vmatprep.mubr.bf16.mxu1 %v1325_v15  ;;  %v3442_v19 = vpop.f32.mrf.mxu0  ;;  %v1235_v25 = vadd.f32 %v3552_v18, %v3440_v17 }
 0x18b   : > { %v3443_v20 = vadd.f32 %v3442_v19, %v3441_v14  ;;  %v3554_v21 = vpop.f32.mrf.mxu1 }
 0x18c   : > { %v3555_v22 = vadd.f32 %v3554_v21, %v3553_v16  ;;  %v3444_v23 = vpop.f32.mrf.mxu0 }
 0x18d   : > { %v3556_v24 = vpop.f32.mrf.mxu1 }
 0x18e   : > { %v1238_v26 = vadd.f32 %v3555_v22, %v3443_v20  ;;  %v3445_v27 = vpop.f32.mrf.mxu0 }
 0x18f   : > { %v3557_v28 = vpop.f32.mrf.mxu1  ;;  %v3446_v32 = vadd.f32 %v3445_v27, %v3444_v23 }
 0x190   : > { %v3447_v29 = vpop.f32.mrf.mxu0  ;;  %v1326_v30 = vpack.c.bf16 %v1238_v26, %v1235_v25  ;;  %v3558_v33 = vadd.f32 %v3557_v28, %v3556_v24 }
 0x191   : > { %v3559_v31 = vpop.f32.mrf.mxu1 }
 0x192   : > { %3737 = vmatmul.mubr.bf16.gmra.mxu1 %v1326_v30  ;;  %v3448_v34 = vpop.f32.mrf.mxu0  ;;  %v1243_v40 = vadd.f32 %v3558_v33, %v3446_v32 }
 0x193   : > { %v3449_v35 = vadd.f32 %v3448_v34, %v3447_v29  ;;  %v3560_v36 = vpop.f32.mrf.mxu1 }
 0x194   : > { %v3561_v37 = vadd.f32 %v3560_v36, %v3559_v31  ;;  %v3450_v38 = vpop.f32.mrf.mxu0 }
 0x195   : > { %v3562_v39 = vpop.f32.mrf.mxu1 }
 0x196   : > { %v1246_v41 = vadd.f32 %v3561_v37, %v3449_v35  ;;  %v3451_v42 = vpop.f32.mrf.mxu0 }
 0x197   : > { %v3563_v43 = vpop.f32.mrf.mxu1  ;;  %v3452_v47 = vadd.f32 %v3451_v42, %v3450_v38 }
 0x198   : > { %v3453_v44 = vpop.f32.mrf.mxu0  ;;  %v1327_v45 = vpack.c.bf16 %v1246_v41, %v1243_v40  ;;  %v3564_v48 = vadd.f32 %v3563_v43, %v3562_v39 }
 0x199   : > { %v3565_v46 = vpop.f32.mrf.mxu1 }
 0x19a   : > { %3740 = vmatprep.mubr.bf16.mxu1 %v1327_v45  ;;  %v3454_v49 = vpop.f32.mrf.mxu0  ;;  %v1251_v55 = vadd.f32 %v3564_v48, %v3452_v47 }
 0x19b   : > { %v3455_v50 = vadd.f32 %v3454_v49, %v3453_v44  ;;  %v3566_v51 = vpop.f32.mrf.mxu1 }
 0x19c   : > { %v3567_v52 = vadd.f32 %v3566_v51, %v3565_v46  ;;  %v3456_v53 = vpop.f32.mrf.mxu0 }
 0x19d   : > { %v3568_v54 = vpop.f32.mrf.mxu1 }
 0x19e   : > { %v1254_v56 = vadd.f32 %v3567_v52, %v3455_v50  ;;  %v3457_v57 = vpop.f32.mrf.mxu0 }
 0x19f   : > { %v3569_v58 = vpop.f32.mrf.mxu1  ;;  %v3458_v62 = vadd.f32 %v3457_v57, %v3456_v53 }
 0x1a0   : > { %v3459_v59 = vpop.f32.mrf.mxu0  ;;  %v1328_v60 = vpack.c.bf16 %v1254_v56, %v1251_v55  ;;  %v3570_v63 = vadd.f32 %v3569_v58, %v3568_v54 }
 0x1a1   : > { %v3571_v61 = vpop.f32.mrf.mxu1 }
 0x1a2   : > { %3741 = vmatmul.mubr.bf16.gmra.mxu1 %v1328_v60  ;;  %v3460_v0 = vpop.f32.mrf.mxu0  ;;  %v1259_v6 = vadd.f32 %v3570_v63, %v3458_v62 }
 0x1a3   : > { %v3461_v1 = vadd.f32 %v3460_v0, %v3459_v59  ;;  %v3572_v2 = vpop.f32.mrf.mxu1 }
 0x1a4   : > { %v3573_v3 = vadd.f32 %v3572_v2, %v3571_v61  ;;  %v3462_v4 = vpop.f32.mrf.mxu0 }
 0x1a5   : > { %v3574_v5 = vpop.f32.mrf.mxu1 }
 0x1a6   : > { %v1262_v7 = vadd.f32 %v3573_v3, %v3461_v1  ;;  %v3463_v8 = vpop.f32.mrf.mxu0 }
 0x1a7   : > { %v3575_v9 = vpop.f32.mrf.mxu1  ;;  %v3464_v13 = vadd.f32 %v3463_v8, %v3462_v4 }
 0x1a8   : > { %v3465_v10 = vpop.f32.mrf.mxu0  ;;  %v1329_v11 = vpack.c.bf16 %v1262_v7, %v1259_v6  ;;  %v3576_v14 = vadd.f32 %v3575_v9, %v3574_v5 }
 0x1a9   : > { %v3577_v12 = vpop.f32.mrf.mxu1 }
 0x1aa   : > { %3744 = vmatprep.mubr.bf16.mxu1 %v1329_v11  ;;  %v3466_v15 = vpop.f32.mrf.mxu0  ;;  %v1267_v21 = vadd.f32 %v3576_v14, %v3464_v13 }
 0x1ab   : > { %v3467_v16 = vadd.f32 %v3466_v15, %v3465_v10  ;;  %v3578_v17 = vpop.f32.mrf.mxu1 }
 0x1ac   : > { %v3579_v18 = vadd.f32 %v3578_v17, %v3577_v12  ;;  %v3468_v19 = vpop.f32.mrf.mxu0 }
 0x1ad   : > { %v3580_v20 = vpop.f32.mrf.mxu1 }
 0x1ae   : > { %v1270_v22 = vadd.f32 %v3579_v18, %v3467_v16  ;;  %v3469_v23 = vpop.f32.mrf.mxu0 }
 0x1af   : > { %v3581_v24 = vpop.f32.mrf.mxu1  ;;  %v3470_v28 = vadd.f32 %v3469_v23, %v3468_v19 }
 0x1b0   : > { %v3471_v25 = vpop.f32.mrf.mxu0  ;;  %v1330_v26 = vpack.c.bf16 %v1270_v22, %v1267_v21  ;;  %v3582_v29 = vadd.f32 %v3581_v24, %v3580_v20 }
 0x1b1   : > { %v3583_v27 = vpop.f32.mrf.mxu1 }
 0x1b2   : > { %3745 = vmatmul.mubr.bf16.gmra.mxu1 %v1330_v26  ;;  %v3472_v30 = vpop.f32.mrf.mxu0  ;;  %v1275_v36 = vadd.f32 %v3582_v29, %v3470_v28 }
 0x1b3   : > { %v3473_v31 = vadd.f32 %v3472_v30, %v3471_v25  ;;  %v3584_v32 = vpop.f32.mrf.mxu1 }
 0x1b4   : > { %v3585_v33 = vadd.f32 %v3584_v32, %v3583_v27  ;;  %v3474_v34 = vpop.f32.mrf.mxu0 }
 0x1b5   : > { %v3586_v35 = vpop.f32.mrf.mxu1 }
 0x1b6   : > { %v1278_v37 = vadd.f32 %v3585_v33, %v3473_v31  ;;  %v3475_v38 = vpop.f32.mrf.mxu0 }
 0x1b7   : > { %v3587_v39 = vpop.f32.mrf.mxu1  ;;  %v3476_v43 = vadd.f32 %v3475_v38, %v3474_v34 }
 0x1b8   : > { %v3477_v40 = vpop.f32.mrf.mxu0  ;;  %v1331_v41 = vpack.c.bf16 %v1278_v37, %v1275_v36  ;;  %v3588_v44 = vadd.f32 %v3587_v39, %v3586_v35 }
 0x1b9   : > { %v3589_v42 = vpop.f32.mrf.mxu1 }
 0x1ba   : > { %3748 = vmatprep.mubr.bf16.mxu1 %v1331_v41  ;;  %v3478_v45 = vpop.f32.mrf.mxu0  ;;  %v1283_v51 = vadd.f32 %v3588_v44, %v3476_v43 }
 0x1bb   : > { %v3479_v46 = vadd.f32 %v3478_v45, %v3477_v40  ;;  %v3590_v47 = vpop.f32.mrf.mxu1 }
 0x1bc   : > { %v3591_v48 = vadd.f32 %v3590_v47, %v3589_v42  ;;  %v3480_v49 = vpop.f32.mrf.mxu0 }
 0x1bd   : > { %v3592_v50 = vpop.f32.mrf.mxu1 }
 0x1be   : > { %v1286_v52 = vadd.f32 %v3591_v48, %v3479_v46  ;;  %v3481_v53 = vpop.f32.mrf.mxu0 }
 0x1bf   : > { %v3593_v54 = vpop.f32.mrf.mxu1  ;;  %v3482_v58 = vadd.f32 %v3481_v53, %v3480_v49 }
 0x1c0   : > { %v3483_v55 = vpop.f32.mrf.mxu0  ;;  %v1332_v56 = vpack.c.bf16 %v1286_v52, %v1283_v51  ;;  %v3594_v59 = vadd.f32 %v3593_v54, %v3592_v50  ;;  %v4806_v51 = vld [vmem:[%s260_s30] ss:$0 sm:$0xff]  ;;  %s3021_s30 = smin.u32 (!%p3020_p9), %s4394_s25, %s1975_s8 }
 0x1c1   : > { %v3595_v57 = vpop.f32.mrf.mxu1  ;;  %s1977_s11 = sand.u32 (!%p3020_p9), 1, %s3021_s30  }
 0x1c2   : > { %3749 = vmatmul.mubr.bf16.gmra.mxu1 %v1332_v56  ;;  %v3484_v60 = vpop.f32.mrf.mxu0  ;;  %v1291_v2 = vadd.f32 %v3594_v59, %v3482_v58  ;;  %s1978_s17 = ssub.s32 (!%p3020_p9), 0, %s1977_s11 }
 0x1c3   : > { %v3485_v61 = vadd.f32 %v3484_v60, %v3483_v55  ;;  %v3596_v62 = vpop.f32.mrf.mxu1 }
 0x1c4   : > { %v3597_v63 = vadd.f32 %v3596_v62, %v3595_v57  ;;  %v3486_v0 = vpop.f32.mrf.mxu0 }
 0x1c5   : > { %v3598_v1 = vpop.f32.mrf.mxu1 }
 0x1c6   : > { %v1294_v3 = vadd.f32 %v3597_v63, %v3485_v61  ;;  %v3487_v4 = vpop.f32.mrf.mxu0 }
 0x1c7   : > { %v3599_v5 = vpop.f32.mrf.mxu1  ;;  %v3488_v9 = vadd.f32 %v3487_v4, %v3486_v0 }
 0x1c8   : > { %v3489_v6 = vpop.f32.mrf.mxu0  ;;  %v1333_v7 = vpack.c.bf16 %v1294_v3, %v1291_v2  ;;  %v3600_v10 = vadd.f32 %v3599_v5, %v3598_v1 }
 0x1c9   : > { %v3601_v8 = vpop.f32.mrf.mxu1 }
 0x1ca   : > { %3752 = vmatprep.mubr.bf16.mxu1 %v1333_v7  ;;  %v3490_v11 = vpop.f32.mrf.mxu0  ;;  %v1299_v17 = vadd.f32 %v3600_v10, %v3488_v9 }
 0x1cb   : > { %v3491_v12 = vadd.f32 %v3490_v11, %v3489_v6  ;;  %v3602_v13 = vpop.f32.mrf.mxu1 }
 0x1cc   : > { %v3603_v14 = vadd.f32 %v3602_v13, %v3601_v8  ;;  %v3492_v15 = vpop.f32.mrf.mxu0 }
 0x1cd   : > { %v3604_v16 = vpop.f32.mrf.mxu1 }
 0x1ce   : > { %v1302_v18 = vadd.f32 %v3603_v14, %v3491_v12  ;;  %v3493_v19 = vpop.f32.mrf.mxu0 }
 0x1cf   : > { %v3605_v20 = vpop.f32.mrf.mxu1  ;;  %v3494_v24 = vadd.f32 %v3493_v19, %v3492_v15 }
 0x1d0   : > { %v3495_v21 = vpop.f32.mrf.mxu0  ;;  %v1334_v22 = vpack.c.bf16 %v1302_v18, %v1299_v17  ;;  %v3606_v25 = vadd.f32 %v3605_v20, %v3604_v16 }
 0x1d1   : > { %v3607_v23 = vpop.f32.mrf.mxu1 }
 0x1d2   : > { %3753 = vmatmul.mubr.bf16.gmra.mxu1 %v1334_v22  ;;  %v3496_v26 = vpop.f32.mrf.mxu0  ;;  %v1307_v32 = vadd.f32 %v3606_v25, %v3494_v24 }
 0x1d3   : > { %v3497_v27 = vadd.f32 %v3496_v26, %v3495_v21  ;;  %v3608_v28 = vpop.f32.mrf.mxu1 }
 0x1d4   : > { %v3609_v29 = vadd.f32 %v3608_v28, %v3607_v23  ;;  %v3498_v30 = vpop.f32.mrf.mxu0 }
 0x1d5   : > { %v3610_v31 = vpop.f32.mrf.mxu1 }
 0x1d6   : > { %v1310_v33 = vadd.f32 %v3609_v29, %v3497_v27  ;;  %v3499_v34 = vpop.f32.mrf.mxu0 }
 0x1d7   : > { %v3611_v35 = vpop.f32.mrf.mxu1  ;;  %v3500_v39 = vadd.f32 %v3499_v34, %v3498_v30 }
 0x1d8   : > { %v3501_v36 = vpop.f32.mrf.mxu0  ;;  %v1335_v37 = vpack.c.bf16 %v1310_v33, %v1307_v32  ;;  %v3612_v40 = vadd.f32 %v3611_v35, %v3610_v31 }
 0x1d9   : > { %v3613_v38 = vpop.f32.mrf.mxu1 }
 0x1da   : > { %3756 = vmatprep.mubr.bf16.mxu1 %v1335_v37  ;;  %v3502_v41 = vpop.f32.mrf.mxu0  ;;  %v1315_v45 = vadd.f32 %v3612_v40, %v3500_v39 }
 0x1db   : > { %v3503_v42 = vadd.f32 %v3502_v41, %v3501_v36  ;;  %v3614_v43 = vpop.f32.mrf.mxu1 }
 0x1dc   : > { %v3615_v44 = vadd.f32 %v3614_v43, %v3613_v38  ;;  %v3682_v48 = vpop.f32.mrf.mxu0 }
 0x1de   : > { %v1318_v46 = vadd.f32 %v3615_v44, %v3503_v42  ;;  %v1547_v49 = vpop.f32.mrf.mxu0 }
 0x1e0   : > { %v1336_v47 = vpack.c.bf16 %v1318_v46, %v1315_v45  ;;  %v3683_v52 = vpop.f32.mrf.mxu0 }
 0x1e2   : > { %3757 = vmatmul.mubr.bf16.gmra.mxu1 %v1336_v47  ;;  %v1550_v58 = vpop.f32.mrf.mxu0 }
 0x1e4   : > { %v3686_v0 = vpop.f32.mrf.mxu0 }
 0x1e6   : > { %v1563_v2 = vpop.f32.mrf.mxu0 }
 0x1e8   : > { %v3687_v4 = vpop.f32.mrf.mxu0 }
 0x1ea   : > { %v1566_v10 = vpop.f32.mrf.mxu0 }
 0x1ec   : > { %v3690_v16 = vpop.f32.mrf.mxu0 }
 0x1ee   : > { %v1579_v18 = vpop.f32.mrf.mxu0 }
 0x1f0   : > { %v3691_v20 = vpop.f32.mrf.mxu0 }
 0x1f2   : > { %v1582_v26 = vpop.f32.mrf.mxu0 }
 0x1f4   : > { %v3694_v32 = vpop.f32.mrf.mxu0 }
 0x1f6   : > { %v1595_v34 = vpop.f32.mrf.mxu0 }
 0x1f8   : > { %v3695_v36 = vpop.f32.mrf.mxu0 }
 0x1fa   : > { %v1598_v42 = vpop.f32.mrf.mxu0 }
 0x232   : > { %v3730_v50 = vpop.f32.mrf.mxu1 }
 0x233   : > { %v1765_v53 = vadd.f32 %v3730_v50, %v3682_v48  ;;  %v3698_v48 = vpop.f32.mrf.mxu0 }
 0x234   : > { %v1756_v54 = vpop.f32.mrf.mxu1 }
 0x235   : > { %v4809_v55 = vadd.f32 %v4806_v51, %v1765_v53  ;;  %v1757_v56 = vadd.f32 %v1756_v54, %v1547_v49  ;;  %v1611_v50 = vpop.f32.mrf.mxu0 }
 0x236   : > { %v3731_v57 = vpop.f32.mrf.mxu1 }
 0x237   : > { %v4812_v59 = vadd.f32 %v4806_v51, %v1757_v56  ;;  %v1768_v60 = vadd.f32 %v3731_v57, %v3683_v52  ;;  %v3699_v53 = vpop.f32.mrf.mxu0 }
 0x238   : > { %v1759_v61 = vpop.f32.mrf.mxu1 }
 0x239   : > { %v4815_v62 = vadd.f32 %v4806_v51, %v1768_v60  ;;  %v1760_v63 = vadd.f32 %v1759_v61, %v1550_v58  ;;  %v1614_v61 = vpop.f32.mrf.mxu0 }
 0x23b   : > { %v4818_v1 = vadd.f32 %v4806_v51, %v1760_v63 }
 0x242   : > { %v3734_v3 = vpop.f32.mrf.mxu1 }
 0x243   : > { %v1781_v5 = vadd.f32 %v3734_v3, %v3686_v0 }
 0x244   : > { %v1772_v6 = vpop.f32.mrf.mxu1 }
 0x245   : > { %v4821_v7 = vadd.f32 %v4806_v51, %v1781_v5  ;;  %v1773_v8 = vadd.f32 %v1772_v6, %v1563_v2  ;;  %v3702_v5 = vpop.f32.mrf.mxu0 }
 0x246   : > { %v3735_v9 = vpop.f32.mrf.mxu1 }
 0x247   : > { %v4824_v11 = vadd.f32 %v4806_v51, %v1773_v8  ;;  %v1784_v12 = vadd.f32 %v3735_v9, %v3687_v4  ;;  %v1627_v8 = vpop.f32.mrf.mxu0 }
 0x248   : > { %v1775_v13 = vpop.f32.mrf.mxu1 }
 0x249   : > { %v4827_v14 = vadd.f32 %v4806_v51, %v1784_v12  ;;  %v1776_v15 = vadd.f32 %v1775_v13, %v1566_v10  ;;  %v3703_v10 = vpop.f32.mrf.mxu0 }
 0x24b   : > { %v4830_v17 = vadd.f32 %v4806_v51, %v1776_v15 }
 0x252   : > { %v3738_v19 = vpop.f32.mrf.mxu1 }
 0x253   : > { %v1797_v21 = vadd.f32 %v3738_v19, %v3690_v16  ;;  %v1630_v19 = vpop.f32.mrf.mxu0 }
 0x254   : > { %v1788_v22 = vpop.f32.mrf.mxu1 }
 0x255   : > { %v4833_v23 = vadd.f32 %v4806_v51, %v1797_v21  ;;  %v1789_v24 = vadd.f32 %v1788_v22, %v1579_v18 }
 0x256   : > { %v3739_v25 = vpop.f32.mrf.mxu1 }
 0x257   : > { %v4836_v27 = vadd.f32 %v4806_v51, %v1789_v24  ;;  %v1800_v28 = vadd.f32 %v3739_v25, %v3691_v20 }
 0x258   : > { %v1791_v29 = vpop.f32.mrf.mxu1 }
 0x259   : > { %v4839_v30 = vadd.f32 %v4806_v51, %v1800_v28  ;;  %v1792_v31 = vadd.f32 %v1791_v29, %v1582_v26  ;;  %v3706_v26 = vpop.f32.mrf.mxu0 }
 0x25b   : > { %v4842_v33 = vadd.f32 %v4806_v51, %v1792_v31  ;;  %v1643_v29 = vpop.f32.mrf.mxu0 }
 0x262   : > { %v3742_v35 = vpop.f32.mrf.mxu1 }
 0x263   : > { %v1813_v37 = vadd.f32 %v3742_v35, %v3694_v32  ;;  %v3707_v32 = vpop.f32.mrf.mxu0 }
 0x264   : > { %v1804_v38 = vpop.f32.mrf.mxu1 }
 0x265   : > { %v4845_v39 = vadd.f32 %v4806_v51, %v1813_v37  ;;  %v1805_v40 = vadd.f32 %v1804_v38, %v1595_v34 }
 0x266   : > { %v3743_v41 = vpop.f32.mrf.mxu1 }
 0x267   : > { %v4848_v43 = vadd.f32 %v4806_v51, %v1805_v40  ;;  %v1816_v44 = vadd.f32 %v3743_v41, %v3695_v36  ;;  %v1646_v40 = vpop.f32.mrf.mxu0 }
 0x268   : > { %v1807_v45 = vpop.f32.mrf.mxu1 }
 0x269   : > { %v4851_v46 = vadd.f32 %v4806_v51, %v1816_v44  ;;  %v1808_v47 = vadd.f32 %v1807_v45, %v1598_v42 }
 0x26b   : > { %v4854_v49 = vadd.f32 %v4806_v51, %v1808_v47 }
 0x272   : > { %v3746_v52 = vpop.f32.mrf.mxu1 }
 0x273   : > { %v1829_v54 = vadd.f32 %v3746_v52, %v3698_v48 }
 0x274   : > { %v1820_v56 = vpop.f32.mrf.mxu1 }
 0x275   : > { %v4857_v57 = vadd.f32 %v4806_v51, %v1829_v54  ;;  %v1821_v58 = vadd.f32 %v1820_v56, %v1611_v50  ;;  %v3710_v50 = vpop.f32.mrf.mxu0 }
 0x276   : > { %v3747_v60 = vpop.f32.mrf.mxu1 }
 0x277   : > { %v4860_v63 = vadd.f32 %v4806_v51, %v1821_v58  ;;  %v1832_v0 = vadd.f32 %v3747_v60, %v3699_v53  ;;  %v1659_v52 = vpop.f32.mrf.mxu0 }
 0x278   : > { %v1823_v2 = vpop.f32.mrf.mxu1 }
 0x279   : > { %v4863_v3 = vadd.f32 %v4806_v51, %v1832_v0  ;;  %v1824_v4 = vadd.f32 %v1823_v2, %v1614_v61  ;;  %v3711_v56 = vpop.f32.mrf.mxu0 }
 0x27b   : > { %v4866_v6 = vadd.f32 %v4806_v51, %v1824_v4 }
 0x282   : > { %v3750_v9 = vpop.f32.mrf.mxu1 }
 0x283   : > { %v1845_v12 = vadd.f32 %v3750_v9, %v3702_v5  ;;  %v1662_v5 = vpop.f32.mrf.mxu0 }
 0x284   : > { %v1836_v13 = vpop.f32.mrf.mxu1 }
 0x285   : > { %v4869_v15 = vadd.f32 %v4806_v51, %v1845_v12  ;;  %v1837_v16 = vadd.f32 %v1836_v13, %v1627_v8 }
 0x286   : > { %v3751_v18 = vpop.f32.mrf.mxu1 }
 0x287   : > { %v4872_v20 = vadd.f32 %v4806_v51, %v1837_v16  ;;  %v1848_v21 = vadd.f32 %v3751_v18, %v3703_v10 }
 0x288   : > { %v1839_v22 = vpop.f32.mrf.mxu1 }
 0x289   : > { %v4875_v24 = vadd.f32 %v4806_v51, %v1848_v21  ;;  %v1840_v25 = vadd.f32 %v1839_v22, %v1630_v19 }
 0x28b   : > { %v4878_v28 = vadd.f32 %v4806_v51, %v1840_v25 }
 0x292   : > { %v3754_v31 = vpop.f32.mrf.mxu1 }
 0x293   : > { %v1861_v34 = vadd.f32 %v3754_v31, %v3706_v26 }
 0x294   : > { %v1852_v35 = vpop.f32.mrf.mxu1 }
 0x295   : > { %v4881_v36 = vadd.f32 %v4806_v51, %v1861_v34  ;;  %v1853_v37 = vadd.f32 %v1852_v35, %v1643_v29 }
 0x296   : > { %v3755_v38 = vpop.f32.mrf.mxu1 }
 0x297   : > { %v4884_v41 = vadd.f32 %v4806_v51, %v1853_v37  ;;  %v1864_v42 = vadd.f32 %v3755_v38, %v3707_v32 }
 0x298   : > { %v1855_v44 = vpop.f32.mrf.mxu1 }
 0x299   : > { %v4887_v45 = vadd.f32 %v4806_v51, %v1864_v42  ;;  %v1856_v47 = vadd.f32 %v1855_v44, %v1646_v40 }
 0x29b   : > { %v4890_v48 = vadd.f32 %v4806_v51, %v1856_v47 }
 0x2a2   : > { %v3758_v53 = vpop.f32.mrf.mxu1 }
 0x2a3   : > { %v1877_v54 = vadd.f32 %v3758_v53, %v3710_v50 }
 0x2a4   : > { %v1868_v58 = vpop.f32.mrf.mxu1 }
 0x2a5   : > { %v4893_v60 = vadd.f32 %v4806_v51, %v1877_v54  ;;  %v1869_v61 = vadd.f32 %v1868_v58, %v1659_v52 }
 0x2a6   : > { %v3759_v0 = vpop.f32.mrf.mxu1 }
 0x2a7   : > { %v4896_v2 = vadd.f32 %v4806_v51, %v1869_v61  ;;  %v1880_v4 = vadd.f32 %v3759_v0, %v3711_v56  ;;  %1925 = sbr.rel (%p3020_p9) target bundleno = 724 (0x2d4), region = 56 }
 0x2a8   : > { %v1871_v8 = vpop.f32.mrf.mxu1 }
 0x2a9   : > { %v4899_v9 = vadd.f32 %v4806_v51, %v1880_v4  ;;  %v1872_v10 = vadd.f32 %v1871_v8, %v1662_v5 }
 0x2ab   : > { %v4902_v12 = vadd.f32 %v4806_v51, %v1872_v10 }
 0x2ac   : > { %v1926_v13 = vmax.f32 %v4812_v59, 0.0  ;;  %v5613_v16 = vmax.f32 %v4818_v1, 0.0  ;;  %v1928_v18 = vmax.f32 %v4809_v55, 0.0  ;;  %v5614_v19 = vmax.f32 %v4815_v62, 0.0  ;;  %s5683_s17 = smov (!%p1974_p1, %s1978_s17), %s1977_s11 }
 0x2ad   : > { %v1930_v21 = vmax.f32 %v4824_v11, 0.0  ;;  %v5615_v51 = vmax.f32 %v4830_v17, 0.0  ;;  %v1932_v22 = vmax.f32 %v4821_v7, 0.0  ;;  %v5616_v25 = vmax.f32 %v4827_v14, 0.0  ;;  %p3023_p2 = scmp.lt.s32.totalorder %s5683_s17, 0  ;;  %s1984_s26 = sadd.s32 2, %s5683_s17 }
 0x2ae   : > { %v1934_v26 = vmax.f32 %v4836_v27, 0.0  ;;  %v1935_v29 = vmax.f32 %v4842_v33, 0.0  ;;  %v1936_v31 = vmax.f32 %v4833_v23, 0.0  ;;  %v5617_v32 = vmax.f32 %v4839_v30, 0.0 }
 0x2af   : > { %v1938_v34 = vmax.f32 %v4848_v43, 0.0  ;;  %v5618_v35 = vmax.f32 %v4854_v49, 0.0  ;;  %v1940_v37 = vmax.f32 %v4845_v39, 0.0  ;;  %v5619_v38 = vmax.f32 %v4851_v46, 0.0  ;;  %s5685_s26 = smov (!%p3023_p2, %s1984_s26), %s5683_s17 }
 0x2b0   : > { %v1942_v40 = vmax.f32 %v4860_v63, 0.0  ;;  %v1943_v42 = vmax.f32 %v4866_v6, 0.0  ;;  %v1944_v44 = vmax.f32 %v4857_v57, 0.0  ;;  %v1945_v47 = vmax.f32 %v4863_v3, 0.0  ;;  %p3024_p6 = scmp.ne.s32.totalorder %s5685_s26, 0 }
 0x2b1   : > { %v5621_v50 = vmax.f32 %v4872_v20, 0.0  ;;  %v5620_v52 = vmax.f32 %v4878_v28, 0.0  ;;  %v1948_v53 = vmax.f32 %v4869_v15, 0.0  ;;  %v1949_v54 = vmax.f32 %v4875_v24, 0.0  ;;  %s3057_s10 = sshll.u32 (!%p3024_p6), %s4659_s21, 2 }
 0x2b2   : > { %v1950_v56 = vmax.f32 %v4884_v41, 0.0  ;;  %v1951_v58 = vmax.f32 %v4890_v48, 0.0  ;;  %v1952_v61 = vmax.f32 %v4881_v36, 0.0  ;;  %v1954_v4 = vmax.f32 %v4896_v2, 0.0  ;;  %1989 = sbr.rel (%p3024_p6) target bundleno = 705 (0x2c1), region = 60  ;;  %s2103_s7 = scalar_lea.vmem (!%p3024_p6), [#allocation3], %s3057_s10 }
 0x2b7   : > { %v3204_v0 = vpack.c.bf16 %v5613_v16, %v1926_v13  ;;  %v3209_v5 = vpack.c.bf16 %v5614_v19, %v1928_v18  ;;  %v3214_v10 = vpack.c.bf16 %v5615_v51, %v1930_v21  ;;  %v3219_v8 = vpack.c.bf16 %v5616_v25, %v1932_v22 }
 0x2b8   : > { %v3224_v16 = vpack.c.bf16 %v1935_v29, %v1934_v26  ;;  %v3229_v19 = vpack.c.bf16 %v5617_v32, %v1936_v31  ;;  %v3234_v51 = vpack.c.bf16 %v5618_v35, %v1938_v34  ;;  %v3239_v25 = vpack.c.bf16 %v5619_v38, %v1940_v37 }
 0x2b9   : > { %3205 = vst [vmem:[%s2103_s7] sm:$0xff] %v3204_v0   ;;  %3361 = vst [vmem:[%s2103_s7 + $0x8] sm:$0xff] %v3209_v5   ;;  %v3244_v32 = vpack.c.bf16 %v1943_v42, %v1942_v40  ;;  %v3249_v35 = vpack.c.bf16 %v1945_v47, %v1944_v44  ;;  %v3254_v38 = vpack.c.bf16 %v5620_v52, %v5621_v50  ;;  %v5642_v52 = vmax.f32 %v4902_v12, 0.0 }
 0x2ba   : > { %3362 = vst [vmem:[%s2103_s7 + $0x10] sm:$0xff] %v3214_v10   ;;  %3363 = vst [vmem:[%s2103_s7 + $0x18] sm:$0xff] %v3219_v8   ;;  %v3259_v0 = vpack.c.bf16 %v1949_v54, %v1948_v53  ;;  %v3264_v5 = vpack.c.bf16 %v1951_v58, %v1950_v56  ;;  %v5641_v8 = vmax.f32 %v4887_v45, 0.0 }
 0x2bb   : > { %3364 = vst [vmem:[%s2103_s7 + $0x20] sm:$0xff] %v3224_v16   ;;  %3365 = vst [vmem:[%s2103_s7 + $0x28] sm:$0xff] %v3229_v19   ;;  %v3274_v50 = vpack.c.bf16 %v5642_v52, %v1954_v4  ;;  %v5643_v16 = vmax.f32 %v4893_v60, 0.0  ;;  %v5644_v19 = vmax.f32 %v4899_v9, 0.0 }
 0x2bc   : > { %3366 = vst [vmem:[%s2103_s7 + $0x30] sm:$0xff] %v3234_v51   ;;  %3367 = vst [vmem:[%s2103_s7 + $0x38] sm:$0xff] %v3239_v25   ;;  %v3269_v10 = vpack.c.bf16 %v5641_v8, %v1952_v61 }
 0x2bd   : > { %v3279_v51 = vpack.c.bf16 %v5644_v19, %v5643_v16  ;;  %3368 = vst [vmem:[%s2103_s7 + $0x40] sm:$0xff] %v3244_v32   ;;  %3369 = vst [vmem:[%s2103_s7 + $0x48] sm:$0xff] %v3249_v35  }
 0x2be   : > { %3370 = vst [vmem:[%s2103_s7 + $0x50] sm:$0xff] %v3254_v38   ;;  %3371 = vst [vmem:[%s2103_s7 + $0x58] sm:$0xff] %v3259_v0  }
 0x2bf   : > { %3372 = vst [vmem:[%s2103_s7 + $0x60] sm:$0xff] %v3264_v5   ;;  %3373 = vst [vmem:[%s2103_s7 + $0x68] sm:$0xff] %v3269_v10  }
 0x2c0   : > { %3374 = vst [vmem:[%s2103_s7 + $0x70] sm:$0xff] %v3274_v50   ;;  %3375 = vst [vmem:[%s2103_s7 + $0x78] sm:$0xff] %v3279_v51  }
 0x2c1 PF: > { %p3058_p7 = scmp.ne.s32.totalorder %s5685_s26, 1 }
 0x2c2   : > { %s3091_s12 = sshll.u32 (!%p3058_p7), %s4659_s21, 2 }
 0x2c3   : > { %2139 = sbr.rel (%p3058_p7) target bundleno = 724 (0x2d4), region = 64  ;;  %s2808_s21 = scalar_lea.vmem (!%p3058_p7), [#allocation3], %s3091_s12 }
 0x2c8   : > { %v5645_v25 = vmax.f32 %v4818_v1, 0.0  ;;  %v5646_v32 = vmax.f32 %v4815_v62, 0.0  ;;  %v5647_v38 = vmax.f32 %v4830_v17, 0.0  ;;  %v5648_v0 = vmax.f32 %v4827_v14, 0.0 }
 0x2c9   : > { %v5649_v8 = vmax.f32 %v4839_v30, 0.0  ;;  %v5650_v10 = vmax.f32 %v4854_v49, 0.0  ;;  %v5651_v16 = vmax.f32 %v4851_v46, 0.0  ;;  %v3339_v19 = vpack.c.bf16 %v1949_v54, %v1948_v53 }
 0x2ca   : > { %v3284_v52 = vpack.c.bf16 %v5645_v25, %v1926_v13  ;;  %v3289_v35 = vpack.c.bf16 %v5646_v32, %v1928_v18  ;;  %v3294_v50 = vpack.c.bf16 %v5647_v38, %v1930_v21  ;;  %v3299_v5 = vpack.c.bf16 %v5648_v0, %v1932_v22 }
 0x2cb   : > { %v3304_v13 = vpack.c.bf16 %v1935_v29, %v1934_v26  ;;  %v3309_v18 = vpack.c.bf16 %v5649_v8, %v1936_v31  ;;  %v3314_v21 = vpack.c.bf16 %v5650_v10, %v1938_v34  ;;  %v3319_v22 = vpack.c.bf16 %v5651_v16, %v1940_v37  ;;  %3387 = vst [vmem:[%s2808_s21 + $0x158] sm:$0xff] %v3339_v19  }
 0x2cc   : > { %3376 = vst [vmem:[%s2808_s21 + $0x100] sm:$0xff] %v3284_v52   ;;  %3377 = vst [vmem:[%s2808_s21 + $0x108] sm:$0xff] %v3289_v35   ;;  %v3324_v26 = vpack.c.bf16 %v1943_v42, %v1942_v40  ;;  %v3329_v29 = vpack.c.bf16 %v1945_v47, %v1944_v44  ;;  %v5652_v31 = vmax.f32 %v4872_v20, 0.0  ;;  %v5653_v34 = vmax.f32 %v4878_v28, 0.0 }
 0x2cd   : > { %3378 = vst [vmem:[%s2808_s21 + $0x110] sm:$0xff] %v3294_v50   ;;  %3379 = vst [vmem:[%s2808_s21 + $0x118] sm:$0xff] %v3299_v5   ;;  %v3344_v40 = vpack.c.bf16 %v1951_v58, %v1950_v56  ;;  %v5654_v42 = vmax.f32 %v4887_v45, 0.0  ;;  %v5655_v47 = vmax.f32 %v4902_v12, 0.0  ;;  %v5656_v53 = vmax.f32 %v4893_v60, 0.0 }
 0x2ce   : > { %v3334_v37 = vpack.c.bf16 %v5653_v34, %v5652_v31  ;;  %3380 = vst [vmem:[%s2808_s21 + $0x120] sm:$0xff] %v3304_v13   ;;  %3381 = vst [vmem:[%s2808_s21 + $0x128] sm:$0xff] %v3309_v18   ;;  %v5657_v54 = vmax.f32 %v4899_v9, 0.0 }
 0x2cf   : > { %3382 = vst [vmem:[%s2808_s21 + $0x130] sm:$0xff] %v3314_v21   ;;  %3383 = vst [vmem:[%s2808_s21 + $0x138] sm:$0xff] %v3319_v22   ;;  %v3349_v44 = vpack.c.bf16 %v5654_v42, %v1952_v61  ;;  %v3354_v51 = vpack.c.bf16 %v5655_v47, %v1954_v4 }
 0x2d0   : > { %v3359_v25 = vpack.c.bf16 %v5657_v54, %v5656_v53  ;;  %3384 = vst [vmem:[%s2808_s21 + $0x140] sm:$0xff] %v3324_v26   ;;  %3385 = vst [vmem:[%s2808_s21 + $0x148] sm:$0xff] %v3329_v29  }
 0x2d1   : > { %3386 = vst [vmem:[%s2808_s21 + $0x150] sm:$0xff] %v3334_v37   ;;  %3388 = vst [vmem:[%s2808_s21 + $0x160] sm:$0xff] %v3344_v40  }
 0x2d2   : > { %3389 = vst [vmem:[%s2808_s21 + $0x168] sm:$0xff] %v3349_v44   ;;  %3390 = vst [vmem:[%s2808_s21 + $0x170] sm:$0xff] %v3354_v51  }
 0x2d3   : > { %3391 = vst [vmem:[%s2808_s21 + $0x178] sm:$0xff] %v3359_v25  }
 0x2d4 PF: > { %p3124_p5 = scmp.ne.s32.totalorder %s4394_s25, 2 }
 0x2d6   : > { %2290 = sbr.rel (%p3124_p5) target bundleno = 1115 (0x45b), region = 68 }
 0x2db   : > { %v2291_v56 = vlaneseq }
 0x2dd   : > { %v5077_v58 = vand.u32 127, %v2291_v56 }
 0x2df   : > { %vm2293_vm0 = vcmp.lt.s32.totalorder %v5077_v58, 16 }
 0x2e0   : > { %v5083_v61 = vsel %vm2293_vm0, %v4812_v59, -1e+30  ;;  %v5088_v4 = vsel %vm2293_vm0, %v4809_v55, -1e+30  ;;  %v5095_v52 = vsel %vm2293_vm0, %v4818_v1, -1e+30 }
 0x2e1   : > { %2326 = vmax.xlane.f32.xlu0 %v5083_v61  ;;  %2330 = vmax.xlane.f32.xlu1 %v5088_v4  ;;  %v5100_v32 = vsel %vm2293_vm0, %v4815_v62, -1e+30  ;;  %v5107_v55 = vsel %vm2293_vm0, %v4824_v11, -1e+30  ;;  %v5112_v59 = vsel %vm2293_vm0, %v4830_v17, -1e+30 }
 0x2e2   : > { %v5119_v62 = vsel %vm2293_vm0, %v4821_v7, -1e+30  ;;  %v5124_v1 = vsel %vm2293_vm0, %v4827_v14, -1e+30  ;;  %v5131_v11 = vsel %vm2293_vm0, %v4836_v27, -1e+30 }
 0x2e3   : > { %v5136_v17 = vsel %vm2293_vm0, %v4842_v33, -1e+30  ;;  %v5143_v7 = vsel %vm2293_vm0, %v4833_v23, -1e+30  ;;  %v5148_v14 = vsel %vm2293_vm0, %v4839_v30, -1e+30 }
 0x2e4   : > { %v5155_v27 = vsel %vm2293_vm0, %v4848_v43, -1e+30  ;;  %v5160_v33 = vsel %vm2293_vm0, %v4854_v49, -1e+30  ;;  %v5167_v23 = vsel %vm2293_vm0, %v4845_v39, -1e+30 }
 0x2e5   : > { %2328 = vmax.xlane.f32.xlu0 %v5095_v52  ;;  %2332 = vmax.xlane.f32.xlu1 %v5100_v32  ;;  %v5172_v30 = vsel %vm2293_vm0, %v4851_v46, -1e+30  ;;  %v5179_v43 = vsel %vm2293_vm0, %v4860_v63, -1e+30  ;;  %v5184_v49 = vsel %vm2293_vm0, %v4866_v6, -1e+30 }
 0x2e6   : > { %v5191_v39 = vsel %vm2293_vm0, %v4857_v57, -1e+30  ;;  %v5196_v46 = vsel %vm2293_vm0, %v4863_v3, -1e+30  ;;  %v5203_v63 = vsel %vm2293_vm0, %v4872_v20, -1e+30 }
 0x2e7   : > { %v5208_v6 = vsel %vm2293_vm0, %v4878_v28, -1e+30  ;;  %v5215_v57 = vsel %vm2293_vm0, %v4869_v15, -1e+30  ;;  %v5220_v3 = vsel %vm2293_vm0, %v4875_v24, -1e+30 }
 0x2e8   : > { %v5227_v20 = vsel %vm2293_vm0, %v4884_v41, -1e+30  ;;  %v5232_v28 = vsel %vm2293_vm0, %v4890_v48, -1e+30  ;;  %v5239_v15 = vsel %vm2293_vm0, %v4881_v36, -1e+30 }
 0x2e9   : > { %2334 = vmax.xlane.f32.xlu0 %v5107_v55  ;;  %2336 = vmax.xlane.f32.xlu1 %v5112_v59  ;;  %v5244_v24 = vsel %vm2293_vm0, %v4887_v45, -1e+30  ;;  %v5251_v41 = vsel %vm2293_vm0, %v4896_v2, -1e+30  ;;  %v5256_v48 = vsel %vm2293_vm0, %v4902_v12, -1e+30 }
 0x2ea   : > { %v5263_v36 = vsel %vm2293_vm0, %v4893_v60, -1e+30  ;;  %v5268_v45 = vsel %vm2293_vm0, %v4899_v9, -1e+30 }
 0x2ed   : > { %2338 = vmax.xlane.f32.xlu0 %v5119_v62  ;;  %2340 = vmax.xlane.f32.xlu1 %v5124_v1 }
 0x2f1   : > { %2342 = vmax.xlane.f32.xlu0 %v5131_v11  ;;  %2344 = vmax.xlane.f32.xlu1 %v5136_v17 }
 0x2f5   : > { %2346 = vmax.xlane.f32.xlu0 %v5143_v7  ;;  %2348 = vmax.xlane.f32.xlu1 %v5148_v14 }
 0x2f9   : > { %2350 = vmax.xlane.f32.xlu0 %v5155_v27  ;;  %2352 = vmax.xlane.f32.xlu1 %v5160_v33 }
 0x2fd   : > { %2354 = vmax.xlane.f32.xlu0 %v5167_v23  ;;  %2356 = vmax.xlane.f32.xlu1 %v5172_v30 }
 0x301   : > { %2358 = vmax.xlane.f32.xlu0 %v5179_v43  ;;  %2360 = vmax.xlane.f32.xlu1 %v5184_v49 }
 0x305   : > { %2362 = vmax.xlane.f32.xlu0 %v5191_v39  ;;  %2364 = vmax.xlane.f32.xlu1 %v5196_v46 }
 0x309   : > { %2366 = vmax.xlane.f32.xlu0 %v5203_v63  ;;  %2368 = vmax.xlane.f32.xlu1 %v5208_v6 }
 0x30d   : > { %2370 = vmax.xlane.f32.xlu0 %v5215_v57  ;;  %2372 = vmax.xlane.f32.xlu1 %v5220_v3 }
 0x311   : > { %2374 = vmax.xlane.f32.xlu0 %v5227_v20  ;;  %2376 = vmax.xlane.f32.xlu1 %v5232_v28 }
 0x315   : > { %2378 = vmax.xlane.f32.xlu0 %v5239_v15  ;;  %2380 = vmax.xlane.f32.xlu1 %v5244_v24 }
 0x319   : > { %2382 = vmax.xlane.f32.xlu0 %v5251_v41  ;;  %2384 = vmax.xlane.f32.xlu1 %v5256_v48 }
 0x31d   : > { %2386 = vmax.xlane.f32.xlu0 %v5263_v36  ;;  %2388 = vmax.xlane.f32.xlu1 %v5268_v45 }
 0x36a   : > { %v2327_v2 = vpop.xlane.xlu0 %2326  ;;  %v2331_v12 = vpop.xlane.xlu1 %2330 }
 0x36b   : > { %v5273_v35 = vsub.f32 %v5083_v61, %v2327_v2  ;;  %v5276_v38 = vsub.f32 %v5088_v4, %v2331_v12 }
 0x36d   : > { %v2422_v60 = vmul.f32 1.442695, %v5273_v35  ;;  %v2426_v50 = vmul.f32 1.442695, %v5276_v38 }
 0x36e   : > { %v2329_v0 = vpop.xlane.xlu0 %2328  ;;  %v2333_v5 = vpop.xlane.xlu1 %2332 }
 0x36f   : > { %4038 = vpow2.f32 %v2422_v60  ;;  %v5281_v9 = vsub.f32 %v5095_v52, %v2329_v0  ;;  %v5284_v13 = vsub.f32 %v5100_v32, %v2333_v5 }
 0x370   : > { %4040 = vpow2.f32 %v2426_v50 }
 0x371   : > { %v2424_v8 = vmul.f32 1.442695, %v5281_v9  ;;  %v2428_v18 = vmul.f32 1.442695, %v5284_v13 }
 0x372   : > { %v2335_v10 = vpop.xlane.xlu0 %2334  ;;  %v2337_v21 = vpop.xlane.xlu1 %2336 }
 0x373   : > { %4042 = vpow2.f32 %v2424_v8  ;;  %v5289_v16 = vsub.f32 %v5107_v55, %v2335_v10  ;;  %v5292_v22 = vsub.f32 %v5112_v59, %v2337_v21 }
 0x374   : > { %4044 = vpow2.f32 %v2428_v18 }
 0x375   : > { %v2430_v26 = vmul.f32 1.442695, %v5289_v16  ;;  %v2432_v29 = vmul.f32 1.442695, %v5292_v22 }
 0x376   : > { %v2339_v31 = vpop.xlane.xlu0 %2338  ;;  %v2341_v34 = vpop.xlane.xlu1 %2340 }
 0x377   : > { %4046 = vpow2.f32 %v2430_v26  ;;  %v5297_v37 = vsub.f32 %v5119_v62, %v2339_v31  ;;  %v5300_v19 = vsub.f32 %v5124_v1, %v2341_v34 }
 0x378   : > { %4048 = vpow2.f32 %v2432_v29 }
 0x379   : > { %v2434_v40 = vmul.f32 1.442695, %v5297_v37  ;;  %v2436_v42 = vmul.f32 1.442695, %v5300_v19 }
 0x37a   : > { %v2343_v44 = vpop.xlane.xlu0 %2342  ;;  %v2345_v47 = vpop.xlane.xlu1 %2344 }
 0x37b   : > { %4050 = vpow2.f32 %v2434_v40  ;;  %v5305_v51 = vsub.f32 %v5131_v11, %v2343_v44  ;;  %v5308_v53 = vsub.f32 %v5136_v17, %v2345_v47 }
 0x37c   : > { %v4039_v54 = vpop.eup %4038  ;;  %4052 = vpow2.f32 %v2436_v42 }
 0x37d   : > { %v4041_v25 = vpop.eup %4040  ;;  %v2438_v56 = vmul.f32 1.442695, %v5305_v51  ;;  %v2440_v61 = vmul.f32 1.442695, %v5308_v53  ;;  %v2486_v4 = vsel %vm2293_vm0, %v4039_v54, 0.0 }
 0x37e   : > { %2518 = vadd.xlane.f32.xlu0 %v2486_v4  ;;  %v2347_v52 = vpop.xlane.xlu0 %2346  ;;  %v2349_v32 = vpop.xlane.xlu1 %2348  ;;  %v2488_v62 = vsel %vm2293_vm0, %v4041_v25, 0.0 }
 0x37f   : > { %4054 = vpow2.f32 %v2438_v56  ;;  %v5315_v55 = vsub.f32 %v5143_v7, %v2347_v52  ;;  %v5318_v59 = vsub.f32 %v5148_v14, %v2349_v32 }
 0x380   : > { %v4043_v1 = vpop.eup %4042  ;;  %4056 = vpow2.f32 %v2440_v61 }
 0x381   : > { %v4045_v11 = vpop.eup %4044  ;;  %v2442_v17 = vmul.f32 1.442695, %v5315_v55  ;;  %v2444_v2 = vmul.f32 1.442695, %v5318_v59  ;;  %v2487_v12 = vsel %vm2293_vm0, %v4043_v1, 0.0 }
 0x382   : > { %2522 = vadd.xlane.f32.xlu0 %v2488_v62  ;;  %2520 = vadd.xlane.f32.xlu1 %v2487_v12  ;;  %v2351_v7 = vpop.xlane.xlu0 %2350  ;;  %v2353_v60 = vpop.xlane.xlu1 %2352  ;;  %v2489_v0 = vsel %vm2293_vm0, %v4045_v11, 0.0 }
 0x383   : > { %4058 = vpow2.f32 %v2442_v17  ;;  %v5327_v14 = vsub.f32 %v5155_v27, %v2351_v7  ;;  %v5330_v50 = vsub.f32 %v5160_v33, %v2353_v60 }
 0x384   : > { %v4047_v5 = vpop.eup %4046  ;;  %4060 = vpow2.f32 %v2444_v2 }
 0x385   : > { %v4049_v8 = vpop.eup %4048  ;;  %v2446_v18 = vmul.f32 1.442695, %v5327_v14  ;;  %v2448_v10 = vmul.f32 1.442695, %v5330_v50  ;;  %v2490_v21 = vsel %vm2293_vm0, %v4047_v5, 0.0 }
 0x386   : > { %2524 = vadd.xlane.f32.xlu1 %v2489_v0  ;;  %2526 = vadd.xlane.f32.xlu0 %v2490_v21  ;;  %v2355_v27 = vpop.xlane.xlu0 %2354  ;;  %v2357_v26 = vpop.xlane.xlu1 %2356  ;;  %v2491_v31 = vsel %vm2293_vm0, %v4049_v8, 0.0 }
 0x387   : > { %4062 = vpow2.f32 %v2446_v18  ;;  %v5339_v33 = vsub.f32 %v5167_v23, %v2355_v27  ;;  %v5342_v29 = vsub.f32 %v5172_v30, %v2357_v26 }
 0x388   : > { %v4051_v34 = vpop.eup %4050  ;;  %4064 = vpow2.f32 %v2448_v10 }
 0x389   : > { %v4053_v40 = vpop.eup %4052  ;;  %v2450_v42 = vmul.f32 1.442695, %v5339_v33  ;;  %v2452_v44 = vmul.f32 1.442695, %v5342_v29  ;;  %v2492_v47 = vsel %vm2293_vm0, %v4051_v34, 0.0 }
 0x38a   : > { %2528 = vadd.xlane.f32.xlu1 %v2491_v31  ;;  %2530 = vadd.xlane.f32.xlu0 %v2492_v47  ;;  %v2359_v23 = vpop.xlane.xlu0 %2358  ;;  %v2361_v54 = vpop.xlane.xlu1 %2360  ;;  %v2493_v56 = vsel %vm2293_vm0, %v4053_v40, 0.0 }
 0x38b   : > { %4066 = vpow2.f32 %v2450_v42  ;;  %v5351_v30 = vsub.f32 %v5179_v43, %v2359_v23  ;;  %v5354_v25 = vsub.f32 %v5184_v49, %v2361_v54 }
 0x38c   : > { %v4055_v61 = vpop.eup %4054  ;;  %4068 = vpow2.f32 %v2452_v44 }
 0x38d   : > { %v4057_v4 = vpop.eup %4056  ;;  %v2454_v52 = vmul.f32 1.442695, %v5351_v30  ;;  %v2456_v32 = vmul.f32 1.442695, %v5354_v25  ;;  %v2494_v62 = vsel %vm2293_vm0, %v4055_v61, 0.0 }
 0x38e   : > { %2532 = vadd.xlane.f32.xlu1 %v2493_v56  ;;  %2534 = vadd.xlane.f32.xlu0 %v2494_v62  ;;  %v2363_v43 = vpop.xlane.xlu0 %2362  ;;  %v2365_v1 = vpop.xlane.xlu1 %2364  ;;  %v2495_v17 = vsel %vm2293_vm0, %v4057_v4, 0.0 }
 0x38f   : > { %4070 = vpow2.f32 %v2454_v52  ;;  %v5363_v49 = vsub.f32 %v5191_v39, %v2363_v43  ;;  %v5366_v11 = vsub.f32 %v5196_v46, %v2365_v1 }
 0x390   : > { %v4059_v2 = vpop.eup %4058  ;;  %4072 = vpow2.f32 %v2456_v32 }
 0x391   : > { %v4061_v12 = vpop.eup %4060  ;;  %v2458_v7 = vmul.f32 1.442695, %v5363_v49  ;;  %v2460_v60 = vmul.f32 1.442695, %v5366_v11  ;;  %v2496_v0 = vsel %vm2293_vm0, %v4059_v2, 0.0 }
 0x392   : > { %2536 = vadd.xlane.f32.xlu1 %v2495_v17  ;;  %2538 = vadd.xlane.f32.xlu0 %v2496_v0  ;;  %v2367_v39 = vpop.xlane.xlu0 %2366  ;;  %v2369_v5 = vpop.xlane.xlu1 %2368  ;;  %v2497_v18 = vsel %vm2293_vm0, %v4061_v12, 0.0 }
 0x393   : > { %4074 = vpow2.f32 %v2458_v7  ;;  %v5375_v46 = vsub.f32 %v5203_v63, %v2367_v39  ;;  %v5378_v8 = vsub.f32 %v5208_v6, %v2369_v5 }
 0x394   : > { %v4063_v10 = vpop.eup %4062  ;;  %4076 = vpow2.f32 %v2460_v60 }
 0x395   : > { %v4065_v21 = vpop.eup %4064  ;;  %v2462_v27 = vmul.f32 1.442695, %v5375_v46  ;;  %v2464_v26 = vmul.f32 1.442695, %v5378_v8  ;;  %v2498_v31 = vsel %vm2293_vm0, %v4063_v10, 0.0 }
 0x396   : > { %2540 = vadd.xlane.f32.xlu1 %v2497_v18  ;;  %2542 = vadd.xlane.f32.xlu0 %v2498_v31  ;;  %v2371_v63 = vpop.xlane.xlu0 %2370  ;;  %v2373_v34 = vpop.xlane.xlu1 %2372  ;;  %v2499_v42 = vsel %vm2293_vm0, %v4065_v21, 0.0 }
 0x397   : > { %4078 = vpow2.f32 %v2462_v27  ;;  %v5387_v6 = vsub.f32 %v5215_v57, %v2371_v63  ;;  %v5390_v40 = vsub.f32 %v5220_v3, %v2373_v34 }
 0x398   : > { %v4067_v44 = vpop.eup %4066  ;;  %4080 = vpow2.f32 %v2464_v26 }
 0x399   : > { %v4069_v47 = vpop.eup %4068  ;;  %v2466_v23 = vmul.f32 1.442695, %v5387_v6  ;;  %v2468_v54 = vmul.f32 1.442695, %v5390_v40  ;;  %v2500_v56 = vsel %vm2293_vm0, %v4067_v44, 0.0 }
 0x39a   : > { %2544 = vadd.xlane.f32.xlu1 %v2499_v42  ;;  %2546 = vadd.xlane.f32.xlu0 %v2500_v56  ;;  %v2375_v57 = vpop.xlane.xlu0 %2374  ;;  %v2377_v61 = vpop.xlane.xlu1 %2376  ;;  %v2501_v52 = vsel %vm2293_vm0, %v4069_v47, 0.0 }
 0x39b   : > { %4082 = vpow2.f32 %v2466_v23  ;;  %v5399_v3 = vsub.f32 %v5227_v20, %v2375_v57  ;;  %v5402_v4 = vsub.f32 %v5232_v28, %v2377_v61 }
 0x39c   : > { %v4071_v32 = vpop.eup %4070  ;;  %4084 = vpow2.f32 %v2468_v54 }
 0x39d   : > { %v4073_v62 = vpop.eup %4072  ;;  %v2470_v43 = vmul.f32 1.442695, %v5399_v3  ;;  %v2472_v1 = vmul.f32 1.442695, %v5402_v4  ;;  %v2502_v17 = vsel %vm2293_vm0, %v4071_v32, 0.0 }
 0x39e   : > { %2548 = vadd.xlane.f32.xlu1 %v2501_v52  ;;  %2550 = vadd.xlane.f32.xlu0 %v2502_v17  ;;  %v2379_v20 = vpop.xlane.xlu0 %2378  ;;  %v2381_v2 = vpop.xlane.xlu1 %2380  ;;  %v2503_v7 = vsel %vm2293_vm0, %v4073_v62, 0.0 }
 0x39f   : > { %4086 = vpow2.f32 %v2470_v43  ;;  %v5411_v28 = vsub.f32 %v5239_v15, %v2379_v20  ;;  %v5414_v12 = vsub.f32 %v5244_v24, %v2381_v2 }
 0x3a0   : > { %v4075_v60 = vpop.eup %4074  ;;  %4088 = vpow2.f32 %v2472_v1 }
 0x3a1   : > { %v4077_v0 = vpop.eup %4076  ;;  %v2474_v39 = vmul.f32 1.442695, %v5411_v28  ;;  %v2476_v5 = vmul.f32 1.442695, %v5414_v12  ;;  %v2504_v18 = vsel %vm2293_vm0, %v4075_v60, 0.0 }
 0x3a2   : > { %2552 = vadd.xlane.f32.xlu1 %v2503_v7  ;;  %2554 = vadd.xlane.f32.xlu0 %v2504_v18  ;;  %v2383_v15 = vpop.xlane.xlu0 %2382  ;;  %v2385_v10 = vpop.xlane.xlu1 %2384  ;;  %v2505_v27 = vsel %vm2293_vm0, %v4077_v0, 0.0 }
 0x3a3   : > { %4090 = vpow2.f32 %v2474_v39  ;;  %v5423_v24 = vsub.f32 %v5251_v41, %v2383_v15  ;;  %v5426_v21 = vsub.f32 %v5256_v48, %v2385_v10 }
 0x3a4   : > { %v4079_v26 = vpop.eup %4078  ;;  %4092 = vpow2.f32 %v2476_v5 }
 0x3a5   : > { %v4081_v31 = vpop.eup %4080  ;;  %v2478_v63 = vmul.f32 1.442695, %v5423_v24  ;;  %v2480_v34 = vmul.f32 1.442695, %v5426_v21  ;;  %v2506_v42 = vsel %vm2293_vm0, %v4079_v26, 0.0 }
 0x3a6   : > { %2556 = vadd.xlane.f32.xlu1 %v2505_v27  ;;  %2558 = vadd.xlane.f32.xlu0 %v2506_v42  ;;  %v2387_v41 = vpop.xlane.xlu0 %2386  ;;  %v2389_v44 = vpop.xlane.xlu1 %2388  ;;  %v2507_v23 = vsel %vm2293_vm0, %v4081_v31, 0.0 }
 0x3a7   : > { %4094 = vpow2.f32 %v2478_v63  ;;  %v5435_v48 = vsub.f32 %v5263_v36, %v2387_v41  ;;  %v5438_v47 = vsub.f32 %v5268_v45, %v2389_v44 }
 0x3a8   : > { %v4083_v54 = vpop.eup %4082  ;;  %4096 = vpow2.f32 %v2480_v34 }
 0x3a9   : > { %v4085_v56 = vpop.eup %4084  ;;  %v2482_v57 = vmul.f32 1.442695, %v5435_v48  ;;  %v2484_v61 = vmul.f32 1.442695, %v5438_v47  ;;  %v2508_v52 = vsel %vm2293_vm0, %v4083_v54, 0.0 }
 0x3aa   : > { %2560 = vadd.xlane.f32.xlu1 %v2507_v23  ;;  %2562 = vadd.xlane.f32.xlu0 %v2508_v52  ;;  %v2509_v36 = vsel %vm2293_vm0, %v4085_v56, 0.0 }
 0x3ab   : > { %4098 = vpow2.f32 %v2482_v57 }
 0x3ac   : > { %v4087_v45 = vpop.eup %4086  ;;  %4100 = vpow2.f32 %v2484_v61 }
 0x3ad   : > { %v4089_v32 = vpop.eup %4088  ;;  %v2510_v62 = vsel %vm2293_vm0, %v4087_v45, 0.0 }
 0x3ae   : > { %2564 = vadd.xlane.f32.xlu1 %v2509_v36  ;;  %2566 = vadd.xlane.f32.xlu0 %v2510_v62  ;;  %v2511_v43 = vsel %vm2293_vm0, %v4089_v32, 0.0 }
 0x3b0   : > { %v4091_v1 = vpop.eup %4090 }
 0x3b1   : > { %v4093_v17 = vpop.eup %4092  ;;  %v2512_v20 = vsel %vm2293_vm0, %v4091_v1, 0.0 }
 0x3b2   : > { %2568 = vadd.xlane.f32.xlu1 %v2511_v43  ;;  %2570 = vadd.xlane.f32.xlu0 %v2512_v20  ;;  %v2513_v2 = vsel %vm2293_vm0, %v4093_v17, 0.0 }
 0x3b4   : > { %v4095_v7 = vpop.eup %4094 }
 0x3b5   : > { %v4097_v60 = vpop.eup %4096  ;;  %v2514_v0 = vsel %vm2293_vm0, %v4095_v7, 0.0 }
 0x3b6   : > { %2572 = vadd.xlane.f32.xlu1 %v2513_v2  ;;  %2574 = vadd.xlane.f32.xlu0 %v2514_v0  ;;  %v2515_v39 = vsel %vm2293_vm0, %v4097_v60, 0.0 }
 0x3b8   : > { %v4099_v5 = vpop.eup %4098 }
 0x3b9   : > { %v4101_v18 = vpop.eup %4100  ;;  %v2516_v15 = vsel %vm2293_vm0, %v4099_v5, 0.0 }
 0x3ba   : > { %2576 = vadd.xlane.f32.xlu1 %v2515_v39  ;;  %2578 = vadd.xlane.f32.xlu0 %v2516_v15  ;;  %v2517_v10 = vsel %vm2293_vm0, %v4101_v18, 0.0 }
 0x3be   : > { %2580 = vadd.xlane.f32.xlu1 %v2517_v10 }
 0x407   : > { %v2519_v27 = vpop.xlane.xlu0 %2518 }
 0x408   : > { %4102 = vlog2.f32 %v2519_v27 }
 0x40b   : > { %v2521_v26 = vpop.xlane.xlu1 %2520  ;;  %v2523_v31 = vpop.xlane.xlu0 %2522 }
 0x40c   : > { %4104 = vlog2.f32 %v2521_v26 }
 0x40d   : > { %4106 = vlog2.f32 %v2523_v31 }
 0x40f   : > { %v2525_v63 = vpop.xlane.xlu1 %2524  ;;  %v2527_v34 = vpop.xlane.xlu0 %2526 }
 0x410   : > { %4108 = vlog2.f32 %v2525_v63 }
 0x411   : > { %4110 = vlog2.f32 %v2527_v34 }
 0x413   : > { %v2529_v42 = vpop.xlane.xlu1 %2528  ;;  %v2531_v41 = vpop.xlane.xlu0 %2530 }
 0x414   : > { %4112 = vlog2.f32 %v2529_v42 }
 0x415   : > { %v4103_v44 = vpop.eup %4102  ;;  %4114 = vlog2.f32 %v2531_v41 }
 0x416   : > { %v2583_v23 = vmul.f32 0.6931472, %v4103_v44 }
 0x417   : > { %v2533_v58 = vpop.xlane.xlu1 %2532  ;;  %v2535_v54 = vpop.xlane.xlu0 %2534 }
 0x418   : > { %v2646_v56 = vsub.f32 %v5273_v35, %v2583_v23  ;;  %4116 = vlog2.f32 %v2533_v58 }
 0x419   : > { %v4105_v57 = vpop.eup %4104  ;;  %4118 = vlog2.f32 %v2535_v54 }
 0x41a   : > { %v4107_v61 = vpop.eup %4106  ;;  %2678 = vst [vmem:[%s4646_s9] sm:$0xff] %v2646_v56  ;;  %v2585_v52 = vmul.f32 0.6931472, %v4105_v57 }
 0x41b   : > { %v2587_v36 = vmul.f32 0.6931472, %v4107_v61  ;;  %v2537_v45 = vpop.xlane.xlu1 %2536  ;;  %v2539_v32 = vpop.xlane.xlu0 %2538 }
 0x41c   : > { %v2647_v62 = vsub.f32 %v5281_v9, %v2585_v52  ;;  %4120 = vlog2.f32 %v2537_v45 }
 0x41d   : > { %v4109_v43 = vpop.eup %4108  ;;  %v2648_v1 = vsub.f32 %v5276_v38, %v2587_v36  ;;  %4122 = vlog2.f32 %v2539_v32 }
 0x41e   : > { %v4111_v35 = vpop.eup %4110  ;;  %2679 = vst [vmem:[%s4646_s9 + $0x8] sm:$0xff] %v2647_v62  ;;  %v2589_v17 = vmul.f32 0.6931472, %v4109_v43 }
 0x41f   : > { %2680 = vst [vmem:[%s4646_s9 + $0x10] sm:$0xff] %v2648_v1  ;;  %v2591_v20 = vmul.f32 0.6931472, %v4111_v35  ;;  %v2541_v2 = vpop.xlane.xlu1 %2540  ;;  %v2543_v7 = vpop.xlane.xlu0 %2542 }
 0x420   : > { %v2649_v60 = vsub.f32 %v5284_v13, %v2589_v17  ;;  %4124 = vlog2.f32 %v2541_v2 }
 0x421   : > { %v4113_v0 = vpop.eup %4112  ;;  %v2650_v9 = vsub.f32 %v5289_v16, %v2591_v20  ;;  %4126 = vlog2.f32 %v2543_v7 }
 0x422   : > { %v4115_v39 = vpop.eup %4114  ;;  %2681 = vst [vmem:[%s4646_s9 + $0x18] sm:$0xff] %v2649_v60  ;;  %v2593_v38 = vmul.f32 0.6931472, %v4113_v0 }
 0x423   : > { %2682 = vst [vmem:[%s4646_s9 + $0x20] sm:$0xff] %v2650_v9  ;;  %v2595_v5 = vmul.f32 0.6931472, %v4115_v39  ;;  %v2545_v18 = vpop.xlane.xlu1 %2544  ;;  %v2547_v15 = vpop.xlane.xlu0 %2546 }
 0x424   : > { %v2651_v10 = vsub.f32 %v5292_v22, %v2593_v38  ;;  %4128 = vlog2.f32 %v2545_v18 }
 0x425   : > { %v4117_v27 = vpop.eup %4116  ;;  %v2652_v13 = vsub.f32 %v5297_v37, %v2595_v5  ;;  %4130 = vlog2.f32 %v2547_v15 }
 0x426   : > { %v4119_v26 = vpop.eup %4118  ;;  %2683 = vst [vmem:[%s4646_s9 + $0x28] sm:$0xff] %v2651_v10  ;;  %v2597_v16 = vmul.f32 0.6931472, %v4117_v27 }
 0x427   : > { %2684 = vst [vmem:[%s4646_s9 + $0x30] sm:$0xff] %v2652_v13  ;;  %v2599_v31 = vmul.f32 0.6931472, %v4119_v26  ;;  %v2549_v63 = vpop.xlane.xlu1 %2548  ;;  %v2551_v34 = vpop.xlane.xlu0 %2550 }
 0x428   : > { %v2653_v42 = vsub.f32 %v5300_v19, %v2597_v16  ;;  %4132 = vlog2.f32 %v2549_v63 }
 0x429   : > { %v4121_v41 = vpop.eup %4120  ;;  %v2654_v22 = vsub.f32 %v5305_v51, %v2599_v31  ;;  %4134 = vlog2.f32 %v2551_v34 }
 0x42a   : > { %v4123_v44 = vpop.eup %4122  ;;  %2685 = vst [vmem:[%s4646_s9 + $0x38] sm:$0xff] %v2653_v42  ;;  %v2601_v37 = vmul.f32 0.6931472, %v4121_v41 }
 0x42b   : > { %2686 = vst [vmem:[%s4646_s9 + $0x40] sm:$0xff] %v2654_v22  ;;  %v2603_v23 = vmul.f32 0.6931472, %v4123_v44  ;;  %v2553_v58 = vpop.xlane.xlu1 %2552  ;;  %v2555_v54 = vpop.xlane.xlu0 %2554 }
 0x42c   : > { %v2655_v56 = vsub.f32 %v5308_v53, %v2601_v37  ;;  %4136 = vlog2.f32 %v2553_v58 }
 0x42d   : > { %v4125_v57 = vpop.eup %4124  ;;  %v2656_v19 = vsub.f32 %v5315_v55, %v2603_v23  ;;  %4138 = vlog2.f32 %v2555_v54 }
 0x42e   : > { %v4127_v61 = vpop.eup %4126  ;;  %2687 = vst [vmem:[%s4646_s9 + $0x48] sm:$0xff] %v2655_v56  ;;  %v2605_v51 = vmul.f32 0.6931472, %v4125_v57 }
 0x42f   : > { %2688 = vst [vmem:[%s4646_s9 + $0x50] sm:$0xff] %v2656_v19  ;;  %v2607_v52 = vmul.f32 0.6931472, %v4127_v61  ;;  %v2557_v36 = vpop.xlane.xlu1 %2556  ;;  %v2559_v45 = vpop.xlane.xlu0 %2558 }
 0x430   : > { %v2657_v32 = vsub.f32 %v5318_v59, %v2605_v51  ;;  %4140 = vlog2.f32 %v2557_v36 }
 0x431   : > { %v4129_v62 = vpop.eup %4128  ;;  %v2658_v53 = vsub.f32 %v5327_v14, %v2607_v52  ;;  %4142 = vlog2.f32 %v2559_v45 }
 0x432   : > { %v4131_v43 = vpop.eup %4130  ;;  %2689 = vst [vmem:[%s4646_s9 + $0x58] sm:$0xff] %v2657_v32  ;;  %v2609_v55 = vmul.f32 0.6931472, %v4129_v62 }
 0x433   : > { %2690 = vst [vmem:[%s4646_s9 + $0x60] sm:$0xff] %v2658_v53  ;;  %v2611_v1 = vmul.f32 0.6931472, %v4131_v43  ;;  %v2561_v35 = vpop.xlane.xlu1 %2560  ;;  %v2563_v17 = vpop.xlane.xlu0 %2562 }
 0x434   : > { %v2659_v20 = vsub.f32 %v5330_v50, %v2609_v55  ;;  %4144 = vlog2.f32 %v2561_v35 }
 0x435   : > { %v4133_v2 = vpop.eup %4132  ;;  %v2660_v59 = vsub.f32 %v5339_v33, %v2611_v1  ;;  %4146 = vlog2.f32 %v2563_v17 }
 0x436   : > { %v4135_v7 = vpop.eup %4134  ;;  %2691 = vst [vmem:[%s4646_s9 + $0x68] sm:$0xff] %v2659_v20  ;;  %v2613_v14 = vmul.f32 0.6931472, %v4133_v2 }
 0x437   : > { %2692 = vst [vmem:[%s4646_s9 + $0x70] sm:$0xff] %v2660_v59  ;;  %v2615_v60 = vmul.f32 0.6931472, %v4135_v7  ;;  %v2565_v0 = vpop.xlane.xlu1 %2564  ;;  %v2567_v9 = vpop.xlane.xlu0 %2566 }
 0x438   : > { %v2661_v39 = vsub.f32 %v5342_v29, %v2613_v14  ;;  %4148 = vlog2.f32 %v2565_v0 }
 0x439   : > { %v4137_v38 = vpop.eup %4136  ;;  %v2662_v50 = vsub.f32 %v5351_v30, %v2615_v60  ;;  %4150 = vlog2.f32 %v2567_v9 }
 0x43a   : > { %v4139_v5 = vpop.eup %4138  ;;  %2693 = vst [vmem:[%s4646_s9 + $0x78] sm:$0xff] %v2661_v39  ;;  %v2617_v33 = vmul.f32 0.6931472, %v4137_v38 }
 0x43b   : > { %2694 = vst [vmem:[%s4646_s9 + $0x80] sm:$0xff] %v2662_v50  ;;  %v2619_v18 = vmul.f32 0.6931472, %v4139_v5  ;;  %v2569_v15 = vpop.xlane.xlu1 %2568  ;;  %v2571_v10 = vpop.xlane.xlu0 %2570 }
 0x43c   : > { %v2663_v27 = vsub.f32 %v5354_v25, %v2617_v33  ;;  %4152 = vlog2.f32 %v2569_v15 }
 0x43d   : > { %v4141_v13 = vpop.eup %4140  ;;  %v2664_v29 = vsub.f32 %v5363_v49, %v2619_v18  ;;  %4154 = vlog2.f32 %v2571_v10 }
 0x43e   : > { %v4143_v26 = vpop.eup %4142  ;;  %2695 = vst [vmem:[%s4646_s9 + $0x88] sm:$0xff] %v2663_v27  ;;  %v2621_v30 = vmul.f32 0.6931472, %v4141_v13 }
 0x43f   : > { %2696 = vst [vmem:[%s4646_s9 + $0x90] sm:$0xff] %v2664_v29  ;;  %v2623_v16 = vmul.f32 0.6931472, %v4143_v26  ;;  %v2573_v31 = vpop.xlane.xlu1 %2572  ;;  %v2575_v63 = vpop.xlane.xlu0 %2574 }
 0x440   : > { %v2665_v34 = vsub.f32 %v5366_v11, %v2621_v30  ;;  %4156 = vlog2.f32 %v2573_v31 }
 0x441   : > { %v4145_v42 = vpop.eup %4144  ;;  %v2666_v25 = vsub.f32 %v5375_v46, %v2623_v16  ;;  %4158 = vlog2.f32 %v2575_v63 }
 0x442   : > { %v4147_v41 = vpop.eup %4146  ;;  %2697 = vst [vmem:[%s4646_s9 + $0x98] sm:$0xff] %v2665_v34  ;;  %v2625_v49 = vmul.f32 0.6931472, %v4145_v42 }
 0x443   : > { %2698 = vst [vmem:[%s4646_s9 + $0xa0] sm:$0xff] %v2666_v25  ;;  %v2627_v22 = vmul.f32 0.6931472, %v4147_v41  ;;  %v2577_v44 = vpop.xlane.xlu1 %2576  ;;  %v2579_v37 = vpop.xlane.xlu0 %2578 }
 0x444   : > { %v2667_v23 = vsub.f32 %v5378_v8, %v2625_v49  ;;  %4160 = vlog2.f32 %v2577_v44 }
 0x445   : > { %v4149_v58 = vpop.eup %4148  ;;  %v2668_v11 = vsub.f32 %v5387_v6, %v2627_v22  ;;  %4162 = vlog2.f32 %v2579_v37 }
 0x446   : > { %v4151_v54 = vpop.eup %4150  ;;  %2699 = vst [vmem:[%s4646_s9 + $0xa8] sm:$0xff] %v2667_v23  ;;  %v2629_v46 = vmul.f32 0.6931472, %v4149_v58 }
 0x447   : > { %2700 = vst [vmem:[%s4646_s9 + $0xb0] sm:$0xff] %v2668_v11  ;;  %v2631_v56 = vmul.f32 0.6931472, %v4151_v54  ;;  %v2581_v57 = vpop.xlane.xlu1 %2580 }
 0x448   : > { %v2669_v19 = vsub.f32 %v5390_v40, %v2629_v46  ;;  %4164 = vlog2.f32 %v2581_v57 }
 0x449   : > { %v4153_v61 = vpop.eup %4152  ;;  %v2670_v8 = vsub.f32 %v5399_v3, %v2631_v56 }
 0x44a   : > { %v4155_v51 = vpop.eup %4154  ;;  %2701 = vst [vmem:[%s4646_s9 + $0xb8] sm:$0xff] %v2669_v19  ;;  %v2633_v52 = vmul.f32 0.6931472, %v4153_v61 }
 0x44b   : > { %2702 = vst [vmem:[%s4646_s9 + $0xc0] sm:$0xff] %v2670_v8  ;;  %v2635_v6 = vmul.f32 0.6931472, %v4155_v51 }
 0x44c   : > { %v2671_v36 = vsub.f32 %v5402_v4, %v2633_v52 }
 0x44d   : > { %v4157_v45 = vpop.eup %4156  ;;  %v2672_v32 = vsub.f32 %v5411_v28, %v2635_v6 }
 0x44e   : > { %v4159_v62 = vpop.eup %4158  ;;  %2703 = vst [vmem:[%s4646_s9 + $0xc8] sm:$0xff] %v2671_v36  ;;  %v2637_v40 = vmul.f32 0.6931472, %v4157_v45 }
 0x44f   : > { %2704 = vst [vmem:[%s4646_s9 + $0xd0] sm:$0xff] %v2672_v32  ;;  %v2639_v53 = vmul.f32 0.6931472, %v4159_v62 }
 0x450   : > { %v2673_v3 = vsub.f32 %v5414_v12, %v2637_v40 }
 0x451   : > { %v4161_v43 = vpop.eup %4160  ;;  %v2674_v55 = vsub.f32 %v5423_v24, %v2639_v53 }
 0x452   : > { %v4163_v1 = vpop.eup %4162  ;;  %2705 = vst [vmem:[%s4646_s9 + $0xd8] sm:$0xff] %v2673_v3  ;;  %v2641_v35 = vmul.f32 0.6931472, %v4161_v43 }
 0x453   : > { %2706 = vst [vmem:[%s4646_s9 + $0xe0] sm:$0xff] %v2674_v55  ;;  %v2643_v4 = vmul.f32 0.6931472, %v4163_v1 }
 0x454   : > { %v2675_v28 = vsub.f32 %v5426_v21, %v2641_v35 }
 0x455   : > { %v4165_v17 = vpop.eup %4164  ;;  %v2676_v20 = vsub.f32 %v5435_v48, %v2643_v4 }
 0x456   : > { %2707 = vst [vmem:[%s4646_s9 + $0xe8] sm:$0xff] %v2675_v28  ;;  %v2645_v2 = vmul.f32 0.6931472, %v4165_v17 }
 0x457   : > { %2708 = vst [vmem:[%s4646_s9 + $0xf0] sm:$0xff] %v2676_v20 }
 0x458   : > { %v2677_v59 = vsub.f32 %v5438_v47, %v2645_v2 }
 0x45a   : > { %2709 = vst [vmem:[%s4646_s9 + $0xf8] sm:$0xff] %v2677_v59 }
 0x45b PF: > { %p2718_p10 = scmp.eq.s32.totalorder %s4394_s25, 2  ;;  %s2726_s15 = sshll.u32 %s4646_s9, 4  ;;  %s5531_s15 = int_to_ptr.vmem [resolvable:$true] %s2726_s15 }
 0x45c   : > { %s5540_s14 = scalar_lea.sflag [#allocation7], %s255_s2  ;;  %s4274_s6 = scalar_lea.vmem %s5531_s15, 4096 }
 0x45d   : > { %s5687_s24 = smov (!%p2718_p10, %s4390_s24), 0  ;;  %p4275_p11 = scmp.ne.s32.totalorder %s5531_s15, %s4274_s6 }
 0x45e   : > { %s3200_s29 = sshll.u32 %s5687_s24, 12  ;;  %s4415_s25 = smov [#allocation10]  }
 0x45f   : > { %s5536_s23 = scalar_lea.hbm %s5605_s5, %s3200_s29  ;;  %p4276_p3 = pnand %p4275_p11, %p4535_p13 }
 0x460   : > { %s4278_s9 = sshll.u32 %s4415_s25, 4  ;;  %s4279_s9 = int_to_ptr.vmem [resolvable:$false] %s4278_s9 }
 0x461   : > { %p4277_p12 = pneg %p4276_p3  ;;  %s4280_s8 = scalar_lea.vmem %s4279_s9, 8192 }
 0x462   : > { %p4281_p8 = scmp.lt.s32.totalorder %s5531_s15, %s4279_s9  ;;  %p4282_p0 = scmp.lt.s32.totalorder %s4280_s8, %s4274_s6 }
 0x464   : > { %p4283_p9 = por %p4282_p0, %p4281_p8 }
 0x466   : > { %p4284_p1 = pnand %p4283_p9, %p4277_p12 }
 0x468   : > { %4287 = shalt.err (!%p4284_p1)
}
 0x469   : > { %s4288_s24 = scalar_lea.hbm %s5536_s23, 4096  ;;  %s4292_s11 = scalar_lea.hbm %s5605_s5, 8192 }
 0x46a   : > { %p4289_p2 = scmp.ne.s32.totalorder %s5536_s23, %s4288_s24  ;;  %p4293_p5 = scmp.lt.s32.totalorder %s5536_s23, %s5605_s5 }
 0x46b   : > { %p4294_p10 = scmp.lt.s32.totalorder %s4292_s11, %s4288_s24 }
 0x46c   : > { %p4290_p6 = pnand %p4289_p2, %p4535_p13 }
 0x46d   : > { %p4295_p11 = por %p4294_p10, %p4293_p5 }
 0x46e   : > { %p4291_p7 = pneg %p4290_p6 }
 0x470   : > { %p4296_p3 = pnand %p4295_p11, %p4291_p7 }
 0x472   : > { %4299 = shalt.err (!%p4296_p3)
}
 0x473   : > { %s4416_s10 = smov 128   ;;  %s4417_s7 = smov 8  }
 0x474   : > { %3769 = dma.vmem_to_hbm [thread:$0]  (%p4535_p13), %s5531_s15, 4096, %s5536_s23, %s5540_s14, %s4416_s10, %s4416_s10, %s4417_s7  }
 0x475 PF: > { %p3783_p12 = scmp.ge.s32.totalorder %s4406_s28, 2  ;;  %s2741_s21 = sand.u32 1, %s4366_s18  }
 0x476   : > { %s2742_s29 = scalar_lea.sflag [#allocation7], %s2741_s21 }
 0x477   : > { %p3779_p8 = pnand %p3783_p12, %p4541_p4 }
 0x479   : > { %p3780_p0 = pneg %p3779_p8 }
 0x47b   : > { %4361 = dma.done.wait (%p3780_p0), %s2742_s29, 4096  }
 0x47c   : > { %4363 = vsyncadd (%p3780_p0), %s2742_s29, 4294963200  ;;  %s24_s28 = sadd.s32 1, %s4406_s28   ;;  %s5659_s13 = sld [smem:[#allocation22_spill]] }
 0x47d   : > { %p21_p9 = scmp.ge.s32.totalorder %s24_s28, 8   ;;  %s5660_s20 = sld [smem:[#allocation29_spill]] }
 0x47e   : > { %s5661_s16 = sld [smem:[#allocation23_spill]]  ;;  %s5666_s18 = smov %s4370_s19 }
 0x47f   : > { %s5662_s23 = sld [smem:[#allocation27_spill]]  ;;  %s5668_s21 = smov %s4382_s22 }
 0x480   : > { %s5663_s24 = sld [smem:[#allocation24_spill]]  ;;  %s5670_s25 = smov %s4402_s27 }
 0x481   : > { %s5664_s26 = sld [smem:[#allocation25_spill]] }
 0x482   : > { %s5665_s15 = sld [smem:[#allocation26_spill]]  ;;  %s5667_s19 = smov %s5659_s13 }
 0x484   : > { %s5669_s22 = smov %s5661_s16  ;;  %23 = sbr.rel (!%p21_p9) target bundleno = 13 (0xd), region = 129 }
 0x488   : > { %s5671_s27 = smov %s5665_s15 }
 0x489   :  { %2747 = vsyncpa [#allocation6], 1 }
 0x48a   :  { %2749 = vsyncpa [#allocation6 + $0x1], 1 }
 0x48b   :  { %2750 = vsyncpa [#allocation9], 1 }
 0x48c   :  { %2752 = vsyncpa [#allocation9 + $0x1], 1 }
 0x48d   :  { %2753 = vsyncpa [#allocation7], 1 }
 0x48e   :  { %2755 = vsyncpa [#allocation7 + $0x1], 1 }
 0x48f   :  { %2756 = vsyncmov [#allocation4] }
 0x492   :  { %s2757_s14 = vpop.sfrf %2756 }
 0x493   :  { %p3130_p13 = scmp.ne.s32.totalorder %s2757_s14, 0 }
 0x495   :  { %2761 = shalt.err (%p3130_p13)  }
 0x496   :  { %2763 = vsyncmov [#allocation4 + $0x1] }
 0x499   :  { %s2764_s6 = vpop.sfrf %2763 }
 0x49a   :  { %p3131_p4 = scmp.ne.s32.totalorder %s2764_s6, 0 }
 0x49c   :  { %2768 = shalt.err (%p3131_p4)  }

</bundles_post_ra>
